<compile_context>
chip_gen: v6e
topology: v6e:2x2x1
jax: 0.10.0
libtpu: 0.0.40
codegen_flags: <defaults>
</compile_context>

<pallas_src>
import jax
import jax.numpy as jnp
from jax.experimental import pallas as pl
from jax.experimental.pallas import tpu as pltpu

INPUT_SIZE = 784
NUM_CLASSES = 10
NUM_NEURONS = 20

# Lane-dense padded dims (multiples of 128).
K_PAD = 896    # 784 -> 7 * 128
H_PAD = 128    # 20  -> 128
C_PAD = 128    # 10  -> 128
NEG_INF = -1e30  # mask value for padded class logits


def firstnnet_kernel(x_ref, w1_ref, b1_ref, w2_ref, b2_ref, o_ref):
    # fc1: bf16 MXU matmul, f32 accumulation.
    z1 = jnp.dot(x_ref[...], w1_ref[...], preferred_element_type=jnp.float32)
    z1 = z1 + b1_ref[...]                                      # (TB, 128) f32

    # sigmoid: exp on the EUP, approximate reciprocal also on the EUP
    # (keeps the divide chain off the VALU critical path).
    h = pl.reciprocal(1.0 + jnp.exp(-z1), approx=True)

    # fc2 (tiny, f32).
    z2 = jnp.dot(h, w2_ref[...], preferred_element_type=jnp.float32)
    z2 = z2 + b2_ref[...]          # padded class lanes get -1e30 bias -> exp()=0

    # Numerically stable log_softmax over the class (lane) dim.
    m = jnp.max(z2, axis=-1, keepdims=True)
    s = z2 - m
    lse = jnp.log(jnp.sum(jnp.exp(s), axis=-1, keepdims=True))
    o_ref[...] = s - lse


def firstnnet_forward(x, w1, b1, w2, b2, *, tb=256):
    """x: (B, 784) f32; w1: (784, 20); b1: (1, 20); w2: (20, 10); b2: (1, 10)."""
    B = x.shape[0]
    B_pad = ((B + tb - 1) // tb) * tb

    # Wrapper-side padding to lane-dense, batch-tileable shapes.
    x_p = jnp.zeros((B_pad, K_PAD), jnp.bfloat16)
    x_p = x_p.at[:B, :INPUT_SIZE].set(x.astype(jnp.bfloat16))
    w1_p = jnp.zeros((K_PAD, H_PAD), jnp.bfloat16)
    w1_p = w1_p.at[:INPUT_SIZE, :NUM_NEURONS].set(w1.astype(jnp.bfloat16))
    b1_p = jnp.zeros((1, H_PAD), jnp.float32).at[:, :NUM_NEURONS].set(b1)
    w2_p = jnp.zeros((H_PAD, C_PAD), jnp.float32)
    w2_p = w2_p.at[:NUM_NEURONS, :NUM_CLASSES].set(w2)
    # Padded class columns get -1e30 bias so they never affect the logsumexp.
    b2_p = jnp.full((1, C_PAD), NEG_INF, jnp.float32).at[:, :NUM_CLASSES].set(b2)

    out_padded = pl.pallas_call(
        firstnnet_kernel,
        out_shape=jax.ShapeDtypeStruct((B_pad, C_PAD), jnp.float32),
        grid=(B_pad // tb,),
        in_specs=[
            pl.BlockSpec((tb, K_PAD), lambda i: (i, 0)),        # x: batch-tiled
            pl.BlockSpec((K_PAD, H_PAD), lambda i: (0, 0)),     # w1: VMEM-resident
            pl.BlockSpec((1, H_PAD), lambda i: (0, 0)),         # b1
            pl.BlockSpec((H_PAD, C_PAD), lambda i: (0, 0)),     # w2
            pl.BlockSpec((1, C_PAD), lambda i: (0, 0)),         # b2
        ],
        out_specs=pl.BlockSpec((tb, C_PAD), lambda i: (i, 0)),  # lane-dense out
        compiler_params=pltpu.CompilerParams(
            dimension_semantics=("parallel",),
        ),
    )(x_p, w1_p, b1_p, w2_p, b2_p)

    return out_padded[:B, :NUM_CLASSES]


def init_params(key):
    """Deterministic init mimicking torch.nn.Linear's U(-1/sqrt(fan_in), +)."""
    k1, k2, k3, k4 = jax.random.split(key, 4)
    bound1 = 1.0 / jnp.sqrt(INPUT_SIZE)
    bound2 = 1.0 / jnp.sqrt(NUM_NEURONS)
    # Stored directly in (in, out) layout (transposed vs torch's (out, in)).
    w1 = jax.random.uniform(k1, (INPUT_SIZE, NUM_NEURONS), jnp.float32,
                            -bound1, bound1)
    b1 = jax.random.uniform(k2, (1, NUM_NEURONS), jnp.float32, -bound1, bound1)
    w2 = jax.random.uniform(k3, (NUM_NEURONS, NUM_CLASSES), jnp.float32,
                            -bound2, bound2)
    b2 = jax.random.uniform(k4, (1, NUM_CLASSES), jnp.float32, -bound2, bound2)
    return w1, b1, w2, b2


def reference_forward_f32(x, w1, b1, w2, b2):
    z1 = x @ w1 + b1
    h = jax.nn.sigmoid(z1)
    z2 = h @ w2 + b2
    return jax.nn.log_softmax(z2, axis=-1)


def reference_forward_matched(x, w1, b1, w2, b2):
    # Matches the kernel's bf16 fc1 matmul with f32 accumulation.
    z1 = jnp.dot(x.astype(jnp.bfloat16), w1.astype(jnp.bfloat16),
                 preferred_element_type=jnp.float32) + b1
    h = jax.nn.sigmoid(z1)
    z2 = h @ w2 + b2
    return jax.nn.log_softmax(z2, axis=-1)


if __name__ == "__main__":
    key = jax.random.PRNGKey(0)
    kx, kp = jax.random.split(key)

    B = 8  # small test batch; kernel pads/tiles the batch internally
    x = jax.random.normal(kx, (B, INPUT_SIZE), jnp.float32)
    w1, b1, w2, b2 = init_params(kp)

    out = firstnnet_forward(x, w1, b1, w2, b2)
    out = jax.block_until_ready(out)
    assert out.shape == (B, NUM_CLASSES)

    # Tight check vs a reference that mirrors the kernel's bf16 fc1 matmul.
    ref_matched = reference_forward_matched(x, w1, b1, w2, b2)
    assert jnp.allclose(out, ref_matched, atol=1e-2, rtol=1e-2), \
        "mismatch vs bf16-matched reference"

    # Looser sanity check vs the full-f32 reference (bf16 fc1 + approx recip).
    ref_f32 = reference_forward_f32(x, w1, b1, w2, b2)
    assert jnp.allclose(out, ref_f32, atol=5e-2, rtol=5e-2), \
        "mismatch vs f32 reference"

    print("KERNEL_OK")
</pallas_src>

<mosaic_0001>
module attributes {stable_mosaic.version = 11 : i64} {
  func.func @firstnnet_kernel(%arg0: i32, %arg1: memref<256x896xbf16, #tpu.memory_space<vmem>>, %arg2: memref<896x128xbf16, #tpu.memory_space<vmem>>, %arg3: memref<1x128xf32, #tpu.memory_space<vmem>>, %arg4: memref<128x128xf32, #tpu.memory_space<vmem>>, %arg5: memref<1x128xf32, #tpu.memory_space<vmem>>, %arg6: memref<256x128xf32, #tpu.memory_space<vmem>>) attributes {dimension_semantics = [#tpu.dimension_semantics<parallel>], iteration_bounds = array<i64: 1>, scalar_prefetch = 0 : i64, scratch_operands = 0 : i64, tpu.core_type = #tpu.core_type<tc>, window_params = [{transform_indices = @transform_0, window_bounds = array<i64: 256, 896>}, {pipeline_mode = #tpu.pipeline_mode<synchronous>, transform_indices = @transform_1, window_bounds = array<i64: 896, 128>}, {pipeline_mode = #tpu.pipeline_mode<synchronous>, transform_indices = @transform_2, window_bounds = array<i64: 1, 128>}, {pipeline_mode = #tpu.pipeline_mode<synchronous>, transform_indices = @transform_3, window_bounds = array<i64: 128, 128>}, {pipeline_mode = #tpu.pipeline_mode<synchronous>, transform_indices = @transform_4, window_bounds = array<i64: 1, 128>}, {transform_indices = @transform_5, window_bounds = array<i64: 256, 128>}]} {
    %c0 = arith.constant 0 : index
    %c0_0 = arith.constant 0 : index
    %0 = vector.load %arg1[%c0, %c0_0] : memref<256x896xbf16, #tpu.memory_space<vmem>>, vector<256x896xbf16>
    %c0_1 = arith.constant 0 : index
    %c0_2 = arith.constant 0 : index
    %1 = vector.load %arg2[%c0_1, %c0_2] : memref<896x128xbf16, #tpu.memory_space<vmem>>, vector<896x128xbf16>
    %cst = arith.constant dense<0.000000e+00> : vector<256x128xf32>
    %2 = tpu.matmul %0, %1, %cst {dimension_numbers = #tpu.dot_dimension_numbers<[1], [0], [0], [1], [0, 0, 1, 1], [], []>} : vector<256x896xbf16>, vector<896x128xbf16>, vector<256x128xf32> -> vector<256x128xf32>
    %c0_3 = arith.constant 0 : index
    %c0_4 = arith.constant 0 : index
    %3 = vector.load %arg3[%c0_3, %c0_4] : memref<1x128xf32, #tpu.memory_space<vmem>>, vector<1x128xf32>
    %4 = vector.broadcast %3 : vector<1x128xf32> to vector<256x128xf32>
    %5 = arith.addf %2, %4 : vector<256x128xf32>
    %cst_5 = arith.constant 0.000000e+00 : f32
    %6 = vector.broadcast %cst_5 : f32 to vector<256x128xf32>
    %7 = arith.subf %6, %5 : vector<256x128xf32>
    %8 = math.exp %7 : vector<256x128xf32>
    %cst_6 = arith.constant 1.000000e+00 : f32
    %9 = vector.broadcast %cst_6 : f32 to vector<256x128xf32>
    %10 = arith.addf %9, %8 : vector<256x128xf32>
    %11 = tpu.reciprocal %10 {approx = true} : vector<256x128xf32> -> vector<256x128xf32>
    %c0_7 = arith.constant 0 : index
    %c0_8 = arith.constant 0 : index
    %12 = vector.load %arg4[%c0_7, %c0_8] : memref<128x128xf32, #tpu.memory_space<vmem>>, vector<128x128xf32>
    %cst_9 = arith.constant dense<0.000000e+00> : vector<256x128xf32>
    %13 = tpu.matmul %11, %12, %cst_9 {dimension_numbers = #tpu.dot_dimension_numbers<[1], [0], [0], [1], [0, 0, 1, 1], [], []>} : vector<256x128xf32>, vector<128x128xf32>, vector<256x128xf32> -> vector<256x128xf32>
    %c0_10 = arith.constant 0 : index
    %c0_11 = arith.constant 0 : index
    %14 = vector.load %arg5[%c0_10, %c0_11] : memref<1x128xf32, #tpu.memory_space<vmem>>, vector<1x128xf32>
    %15 = vector.broadcast %14 : vector<1x128xf32> to vector<256x128xf32>
    %16 = arith.addf %13, %15 : vector<256x128xf32>
    %cst_12 = arith.constant dense<0xFF800000> : vector<256xf32>
    %17 = vector.multi_reduction <maximumf>, %16, %cst_12 [1] : vector<256x128xf32> to vector<256xf32>
    %18 = vector.shape_cast %17 : vector<256xf32> to vector<256x1xf32>
    %19 = vector.broadcast %18 : vector<256x1xf32> to vector<256x128xf32>
    %20 = arith.subf %16, %19 : vector<256x128xf32>
    %21 = math.exp %20 : vector<256x128xf32>
    %cst_13 = arith.constant dense<0.000000e+00> : vector<256xf32>
    %22 = vector.multi_reduction <add>, %21, %cst_13 [1] : vector<256x128xf32> to vector<256xf32>
    %23 = vector.shape_cast %22 : vector<256xf32> to vector<256x1xf32>
    %24 = math.log %23 : vector<256x1xf32>
    %25 = vector.broadcast %24 : vector<256x1xf32> to vector<256x128xf32>
    %26 = arith.subf %20, %25 : vector<256x128xf32>
    %c0_14 = arith.constant 0 : index
    %c0_15 = arith.constant 0 : index
    %27 = vector.load %arg6[%c0_14, %c0_15] : memref<256x128xf32, #tpu.memory_space<vmem>>, vector<256x128xf32>
    tpu.vector_store %arg6[%c0_14, %c0_15], %26 {strides = array<i32>} : memref<256x128xf32, #tpu.memory_space<vmem>>, vector<256x128xf32>,
    return
  }
  func.func @transform_0(%arg0: i32) -> (i32, i32) {
    %c0_i32 = arith.constant 0 : i32
    %c0_i32_0 = arith.constant 0 : i32
    return %arg0, %c0_i32 : i32, i32
  }
  func.func @transform_1(%arg0: i32) -> (i32, i32) {
    %c0_i32 = arith.constant 0 : i32
    %c0_i32_0 = arith.constant 0 : i32
    %c0_i32_1 = arith.constant 0 : i32
    return %c0_i32, %c0_i32_0 : i32, i32
  }
  func.func @transform_2(%arg0: i32) -> (i32, i32) {
    %c0_i32 = arith.constant 0 : i32
    %c0_i32_0 = arith.constant 0 : i32
    %c0_i32_1 = arith.constant 0 : i32
    return %c0_i32, %c0_i32_0 : i32, i32
  }
  func.func @transform_3(%arg0: i32) -> (i32, i32) {
    %c0_i32 = arith.constant 0 : i32
    %c0_i32_0 = arith.constant 0 : i32
    %c0_i32_1 = arith.constant 0 : i32
    return %c0_i32, %c0_i32_0 : i32, i32
  }
  func.func @transform_4(%arg0: i32) -> (i32, i32) {
    %c0_i32 = arith.constant 0 : i32
    %c0_i32_0 = arith.constant 0 : i32
    %c0_i32_1 = arith.constant 0 : i32
    return %c0_i32, %c0_i32_0 : i32, i32
  }
  func.func @transform_5(%arg0: i32) -> (i32, i32) {
    %c0_i32 = arith.constant 0 : i32
    %c0_i32_0 = arith.constant 0 : i32
    return %arg0, %c0_i32 : i32, i32
  }
}

</mosaic_0001>

<bundles_post_ra>
// kernel: tpu_custom_call.1
= control target key start
LH: loop header
LB: loop body
LE: loop exit
PB: predicated region body
PF: predicated region fallthrough
CT: control target
= control target key end

     0   :  { %10 = vsyncpa [#allocation3], 0  ;;  %s4414_s0 = inlined_call_operand.hbm [shape: bf16[256,896], index: 0, kind: input, shape index: {}]   ;;  %s4415_s1 = inlined_call_operand.hbm [shape: bf16[896,128], index: 1, kind: input, shape index: {}]   ;;  %s4416_s2 = inlined_call_operand.vmem [shape: f32[1,128], index: 2, kind: input, shape index: {}]   ;;  %s4417_s3 = inlined_call_operand.hbm [shape: f32[128,128], index: 3, kind: input, shape index: {}]   ;;  %s4418_s4 = inlined_call_operand.vmem [shape: f32[1,128], index: 4, kind: input, shape index: {}]   ;;  %s4419_s5 = inlined_call_operand.hbm [shape: f32[256,128], index: 5, kind: output, shape index: {}]  }
   0x1   :  { %11 = vsyncpa [#allocation6], 0 }
   0x2   :  { %12 = vsyncpa [#allocation4], 0  ;;  %s3918_s18 = smov [#allocation5]  }
   0x3   :  { %s30_s19 = sshll.u32 %s3918_s18, 4  ;;  %s31_s19 = int_to_ptr.vmem [resolvable:$true] %s30_s19 }
   0x4   :  { %s3840_s20 = scalar_lea.vmem %s31_s19, 7168  ;;  %p3845_p1 = scmp.lt.s32.totalorder %s31_s19, %s31_s19 }
   0x5   :  { %p3841_p0 = scmp.ne.s32.totalorder %s31_s19, %s3840_s20  ;;  %p3846_p2 = scmp.lt.s32.totalorder %s3840_s20, %s3840_s20 }
   0x7   :  { %p3847_p3 = por %p3846_p2, %p3845_p1 }
   0x9   :  { %p3848_p4 = pnand %p3847_p3, %p3841_p0 }
   0xb   :  { %3851 = shalt.err (!%p3848_p4)
}
   0xc   :  { %s3919_s21 = smov 64   ;;  %s3920_s22 = smov 4  }
   0xd   :  { %36 = dma.hbm_to_vmem [thread:$0]  %s4415_s1, 7168, %s31_s19, [#allocation6], %s3919_s21, %s3919_s21, %s3920_s22  }
   0xe   :  { %s3921_s25 = smov [#allocation2]  }
   0xf   :  { %s18_s26 = sshll.u32 %s3921_s25, 4  ;;  %s19_s26 = int_to_ptr.vmem [resolvable:$true] %s18_s26 }
  0x10   :  { %s3860_s27 = scalar_lea.vmem %s19_s26, 14336  ;;  %p3865_p6 = scmp.lt.s32.totalorder %s19_s26, %s19_s26 }
  0x11   :  { %p3861_p5 = scmp.ne.s32.totalorder %s19_s26, %s3860_s27  ;;  %p3866_p7 = scmp.lt.s32.totalorder %s3860_s27, %s3860_s27 }
  0x13   :  { %p3867_p8 = por %p3866_p7, %p3865_p6 }
  0x15   :  { %p3868_p9 = pnand %p3867_p8, %p3861_p5 }
  0x17   :  { %3871 = shalt.err (!%p3868_p9)
}
  0x18   :  { %s3922_s28 = smov 448   ;;  %s3923_s29 = smov 28  }
  0x19   :  { %24 = dma.hbm_to_vmem [thread:$0]  %s4414_s0, 14336, %s19_s26, [#allocation3], %s3922_s28, %s3922_s28, %s3923_s29  }
  0x1a   :  { %s3924_s7 = smov [#allocation7]  }
  0x1b   :  { %s44_s8 = sshll.u32 %s3924_s7, 4  ;;  %s45_s8 = int_to_ptr.vmem [resolvable:$true] %s44_s8 }
  0x1c   :  { %s3880_s1 = scalar_lea.vmem %s45_s8, 2048  ;;  %p3885_p11 = scmp.lt.s32.totalorder %s45_s8, %s45_s8 }
  0x1d   :  { %p3881_p10 = scmp.ne.s32.totalorder %s45_s8, %s3880_s1  ;;  %p3886_p12 = scmp.lt.s32.totalorder %s3880_s1, %s3880_s1 }
  0x1f   :  { %p3887_p13 = por %p3886_p12, %p3885_p11 }
  0x21   :  { %p3888_p0 = pnand %p3887_p13, %p3881_p10 }
  0x23   :  { %3891 = shalt.err (!%p3888_p0)
}
  0x24   :  { %s3925_s9 = smov 128   ;;  %s3926_s10 = smov 8  }
  0x25   :  { %50 = dma.hbm_to_vmem [thread:$0]  %s4417_s3, 2048, %s45_s8, [#allocation6], %s3925_s9, %s3925_s9, %s3926_s10  }
  0x26   :  { %3912 = dma.done.wait [#allocation3], 14336  }
  0x27   :  { %3913 = vsyncadd [#allocation3], 4294952960 }
  0x28   :  { %3914 = dma.done.wait [#allocation6], 9216  }
  0x29   :  { %3915 = vsyncadd [#allocation6], 4294958080  ;;  %v3360_v0 = vld [vmem:[#allocation5 + $0x78] sm:$0xff]   ;;  %v3364_v4 = vld [vmem:[#allocation5 + $0x70] sm:$0xff]  }
  0x2a   :  { %v3361_v1 = vld [vmem:[#allocation5 + $0x38] sm:$0xff]   ;;  %2814 = vmatprep.subr.bf16.mxu0 %v3360_v0  ;;  %v3365_v5 = vld [vmem:[#allocation5 + $0x30] sm:$0xff]   ;;  %v3368_v8 = vld [vmem:[#allocation5 + $0x68] sm:$0xff]  }
  0x2b   :  { %v3362_v2 = vld [vmem:[#allocation5 + $0xf8] sm:$0xff]   ;;  %2815 = vmatpush3.bf16.msra.mxu0 %v3361_v1  ;;  %v3366_v6 = vld [vmem:[#allocation5 + $0xf0] sm:$0xff]   ;;  %v3369_v9 = vld [vmem:[#allocation5 + $0x28] sm:$0xff]  }
  0x2c   :  { %v3363_v3 = vld [vmem:[#allocation5 + $0xb8] sm:$0xff]   ;;  %2926 = vmatprep.subr.bf16.mxu1 %v3362_v2  ;;  %2816 = vmatprep.subr.bf16.mxu0 %v3364_v4  ;;  %v3367_v7 = vld [vmem:[#allocation5 + $0xb0] sm:$0xff]   ;;  %v3370_v10 = vld [vmem:[#allocation5 + $0xe8] sm:$0xff]  }
  0x2d   :  { %2927 = vmatpush3.bf16.msra.mxu1 %v3363_v3  ;;  %v3371_v11 = vld [vmem:[#allocation5 + $0xa8] sm:$0xff]   ;;  %v3372_v12 = vld [vmem:[#allocation5 + $0x60] sm:$0xff]   ;;  %v3376_v16 = vld [vmem:[#allocation5 + $0x58] sm:$0xff]  }
  0x2e   :  { %2928 = vmatprep.subr.bf16.mxu1 %v3366_v6  ;;  %v3373_v13 = vld [vmem:[#allocation5 + $0x20] sm:$0xff]   ;;  %v3377_v17 = vld [vmem:[#allocation5 + $0x18] sm:$0xff]   ;;  %v3380_v20 = vld [vmem:[#allocation5 + $0x50] sm:$0xff]  }
  0x2f   :  { %2817 = vmatpush3.bf16.msra.mxu0 %v3365_v5  ;;  %v3374_v14 = vld [vmem:[#allocation5 + $0xe0] sm:$0xff]   ;;  %v3378_v18 = vld [vmem:[#allocation5 + $0xd8] sm:$0xff]   ;;  %v3381_v21 = vld [vmem:[#allocation5 + $0x10] sm:$0xff]  }
  0x30   :  { %2818 = vmatprep.subr.bf16.mxu0 %v3368_v8  ;;  %v3375_v15 = vld [vmem:[#allocation5 + $0xa0] sm:$0xff]   ;;  %v3379_v19 = vld [vmem:[#allocation5 + $0x98] sm:$0xff]   ;;  %v3382_v22 = vld [vmem:[#allocation5 + $0xd0] sm:$0xff]  }
  0x31   :  { %2929 = vmatpush3.bf16.msra.mxu1 %v3367_v7  ;;  %v3383_v23 = vld [vmem:[#allocation5 + $0x90] sm:$0xff]   ;;  %v3384_v24 = vld [vmem:[#allocation5 + $0x48] sm:$0xff]   ;;  %v3388_v28 = vld [vmem:[#allocation5 + $0x40] sm:$0xff]  }
  0x32   :  { %2930 = vmatprep.subr.bf16.mxu1 %v3370_v10  ;;  %v3385_v25 = vld [vmem:[#allocation5 + $0x8] sm:$0xff]   ;;  %v3389_v29 = vld [vmem:[#allocation5] sm:$0xff]   ;;  %v3395_v34 = vld [vmem:[#allocation5 + $0x178] sm:$0xff]  }
  0x33   :  { %2819 = vmatpush3.bf16.msra.mxu0 %v3369_v9  ;;  %v3386_v26 = vld [vmem:[#allocation5 + $0xc8] sm:$0xff]   ;;  %v3390_v30 = vld [vmem:[#allocation5 + $0xc0] sm:$0xff]   ;;  %v3399_v37 = vld [vmem:[#allocation5 + $0x138] sm:$0xff]  }
  0x34   :  { %2820 = vmatprep.subr.bf16.mxu0 %v3372_v12  ;;  %v3387_v27 = vld [vmem:[#allocation5 + $0x88] sm:$0xff]   ;;  %v3391_v31 = vld [vmem:[#allocation2] ss:$28 sps:$4 sm:$0xff]   ;;  %v3402_v40 = vld [vmem:[#allocation2 + $0x38] ss:$28 sps:$4 sm:$0xff]  }
  0x35   :  { %2931 = vmatpush3.bf16.msra.mxu1 %v3371_v11  ;;  %v3393_v32 = vld [vmem:[#allocation2 + $0x4] ss:$28 sps:$4 sm:$0xff]   ;;  %v3398_v36 = vld [vmem:[#allocation2 + $0xc] ss:$28 sps:$4 sm:$0xff]   ;;  %v3400_v38 = vld [vmem:[#allocation2 + $0x3c] ss:$28 sps:$4 sm:$0xff]  }
  0x36   :  { %2932 = vmatprep.subr.bf16.mxu1 %v3374_v14  ;;  %v3394_v33 = vld [vmem:[#allocation5 + $0x80] sm:$0xff]   ;;  %1254 = vmatprep.mubr.bf16.mxu0 %v3393_v32  ;;  %v3406_v41 = vld [vmem:[#allocation2 + $0x74] ss:$28 sps:$4 sm:$0xff]   ;;  %v3410_v44 = vld [vmem:[#allocation2 + $0x7c] ss:$28 sps:$4 sm:$0xff]  }
  0x37   :  { %2821 = vmatpush3.bf16.msra.mxu0 %v3373_v13  ;;  %v3396_v35 = vld [vmem:[#allocation2 + $0x8] ss:$28 sps:$4 sm:$0xff]   ;;  %1415 = vmatprep.mubr.bf16.mxu1 %v3398_v36  ;;  %v3409_v42 = vld [vmem:[#allocation5 + $0x170] sm:$0xff]   ;;  %v3405_v43 = vld [vmem:[#allocation2 + $0x40] ss:$28 sps:$4 sm:$0xff]  }
  0x38   :  { %2822 = vmatprep.subr.bf16.mxu0 %v3376_v16  ;;  %v3403_v39 = vld [vmem:[#allocation2 + $0x44] ss:$28 sps:$4 sm:$0xff]   ;;  %v3412_v45 = vld [vmem:[#allocation5 + $0x130] sm:$0xff]   ;;  %v3414_v47 = vld [vmem:[#allocation2 + $0xac] ss:$28 sps:$4 sm:$0xff]  }
  0x39   :  { %2933 = vmatpush3.bf16.msra.mxu1 %v3375_v15  ;;  %v3408_v46 = vld [vmem:[#allocation2 + $0x70] ss:$28 sps:$4 sm:$0xff]   ;;  %v3413_v49 = vld [vmem:[#allocation2 + $0x78] ss:$28 sps:$4 sm:$0xff]   ;;  %v3416_v52 = vld [vmem:[#allocation2 + $0xa8] ss:$28 sps:$4 sm:$0xff]  }
  0x3a   :  { %2934 = vmatprep.subr.bf16.mxu1 %v3378_v18  ;;  %v3423_v48 = vld [vmem:[#allocation5 + $0x168] sm:$0xff]   ;;  %v3417_v51 = vld [vmem:[#allocation2 + $0xb4] ss:$28 sps:$4 sm:$0xff]   ;;  %v3420_v53 = vld [vmem:[#allocation2 + $0xe4] ss:$28 sps:$4 sm:$0xff]  }
  0x3b   :  { %2823 = vmatpush3.bf16.msra.mxu0 %v3377_v17  ;;  %v3426_v50 = vld [vmem:[#allocation5 + $0x128] sm:$0xff]   ;;  %v3437_v54 = vld [vmem:[#allocation5 + $0x160] sm:$0xff]   ;;  %v3448_v58 = vld [vmem:[#allocation5 + $0x1b8] sm:$0xff]  }
  0x3c   :  { %2824 = vmatprep.subr.bf16.mxu0 %v3380_v20  ;;  %v3419_v55 = vld [vmem:[#allocation2 + $0xb0] ss:$28 sps:$4 sm:$0xff]   ;;  %v3440_v56 = vld [vmem:[#allocation5 + $0x120] sm:$0xff]   ;;  %v3428_v60 = vld [vmem:[#allocation2 + $0x11c] ss:$28 sps:$4 sm:$0xff]  }
  0x3d   :  { %2935 = vmatpush3.bf16.msra.mxu1 %v3379_v19  ;;  %v3424_v57 = vld [vmem:[#allocation2 + $0xec] ss:$28 sps:$4 sm:$0xff]   ;;  %v3422_v59 = vld [vmem:[#allocation2 + $0xe0] ss:$28 sps:$4 sm:$0xff]   ;;  %v3463_v1 = vld [vmem:[#allocation5 + $0x1b0] sm:$0xff]  }
  0x3e   :  { %2936 = vmatprep.subr.bf16.mxu1 %v3382_v22  ;;  %v3452_v61 = vld [vmem:[#allocation5 + $0x158] sm:$0xff]   ;;  %v3427_v62 = vld [vmem:[#allocation2 + $0xe8] ss:$28 sps:$4 sm:$0xff]   ;;  %v3434_v3 = vld [vmem:[#allocation2 + $0x154] ss:$28 sps:$4 sm:$0xff]  }
  0x3f   :  { %2825 = vmatpush3.bf16.msra.mxu0 %v3381_v21  ;;  %v3455_v63 = vld [vmem:[#allocation5 + $0x118] sm:$0xff]   ;;  %v3431_v0 = vld [vmem:[#allocation2 + $0x124] ss:$28 sps:$4 sm:$0xff]   ;;  %v3467_v4 = vld [vmem:[#allocation5 + $0x150] sm:$0xff]  }
  0x40   :  { %2826 = vmatprep.subr.bf16.mxu0 %v3384_v24  ;;  %v3430_v2 = vld [vmem:[#allocation2 + $0x118] ss:$28 sps:$4 sm:$0xff]   ;;  %v3433_v5 = vld [vmem:[#allocation2 + $0x120] ss:$28 sps:$4 sm:$0xff]   ;;  %v3478_v8 = vld [vmem:[#allocation5 + $0x1a8] sm:$0xff]  }
  0x41   :  { %2937 = vmatpush3.bf16.msra.mxu1 %v3383_v23  ;;  %v3470_v6 = vld [vmem:[#allocation5 + $0x110] sm:$0xff]   ;;  %v3438_v7 = vld [vmem:[#allocation2 + $0x15c] ss:$28 sps:$4 sm:$0xff]   ;;  %v3442_v10 = vld [vmem:[#allocation2 + $0x18c] ss:$28 sps:$4 sm:$0xff]  }
  0x42   :  { %2938 = vmatprep.subr.bf16.mxu1 %v3386_v26  ;;  %v3436_v9 = vld [vmem:[#allocation2 + $0x150] ss:$28 sps:$4 sm:$0xff]   ;;  %v3441_v12 = vld [vmem:[#allocation2 + $0x158] ss:$28 sps:$4 sm:$0xff]   ;;  %v3444_v15 = vld [vmem:[#allocation2 + $0x188] ss:$28 sps:$4 sm:$0xff]  }
  0x43   :  { %2827 = vmatpush3.bf16.msra.mxu0 %v3385_v25  ;;  %v3482_v11 = vld [vmem:[#allocation5 + $0x148] sm:$0xff]   ;;  %v3445_v13 = vld [vmem:[#allocation2 + $0x194] ss:$28 sps:$4 sm:$0xff]   ;;  %v3493_v16 = vld [vmem:[#allocation5 + $0x1a0] sm:$0xff]  }
  0x44   :  { %2828 = vmatprep.subr.bf16.mxu0 %v3388_v28  ;;  %v3485_v14 = vld [vmem:[#allocation5 + $0x108] sm:$0xff]   ;;  %v3449_v17 = vld [vmem:[#allocation2 + $0x1c4] ss:$28 sps:$4 sm:$0xff]   ;;  %v3502_v22 = vld [vmem:[#allocation5 + $0x198] sm:$0xff]  }
  0x45   :  { %2939 = vmatpush3.bf16.msra.mxu1 %v3387_v27  ;;  %v3497_v18 = vld [vmem:[#allocation5 + $0x140] sm:$0xff]   ;;  %v3447_v19 = vld [vmem:[#allocation2 + $0x190] ss:$28 sps:$4 sm:$0xff]   ;;  %v3457_v25 = vld [vmem:[#allocation2 + $0x1fc] ss:$28 sps:$4 sm:$0xff]  }
  0x46   :  { %2940 = vmatprep.subr.bf16.mxu1 %v3390_v30  ;;  %v3453_v20 = vld [vmem:[#allocation2 + $0x1cc] ss:$28 sps:$4 sm:$0xff]   ;;  %v3500_v21 = vld [vmem:[#allocation5 + $0x100] sm:$0xff]   ;;  %v3506_v24 = vld [vmem:[#allocation5 + $0x190] sm:$0xff]  }
  0x47   :  { %2829 = vmatpush3.bf16.msra.mxu0 %v3389_v29  ;;  %v3451_v23 = vld [vmem:[#allocation2 + $0x1c0] ss:$28 sps:$4 sm:$0xff]   ;;  %v3510_v26 = vld [vmem:[#allocation5 + $0x188] sm:$0xff]   ;;  %v3459_v30 = vld [vmem:[#allocation2 + $0x1f8] ss:$28 sps:$4 sm:$0xff]  }
  0x48   :  { %3038 = vmatprep.subr.bf16.mxu0 %v3395_v34  ;;  %v3456_v27 = vld [vmem:[#allocation2 + $0x1c8] ss:$28 sps:$4 sm:$0xff]   ;;  %v3462_v32 = vld [vmem:[#allocation2 + $0x200] ss:$28 sps:$4 sm:$0xff]   ;;  %v3466_v34 = vld [vmem:[#allocation2 + $0x230] ss:$28 sps:$4 sm:$0xff]  }
  0x49   :  { %2941 = vmatpush3.bf16.msra.mxu1 %v3394_v33  ;;  %v3460_v28 = vld [vmem:[#allocation2 + $0x204] ss:$28 sps:$4 sm:$0xff]   ;;  %v3468_v33 = vld [vmem:[#allocation2 + $0x23c] ss:$28 sps:$4 sm:$0xff]  }
  0x4a   :  { %1255 = vmatmul.mubr.bf16.vlgmr.msra.gmra.mxu0 %v3391_v31  ;;  %3222 = vmatprep.subr.bf16.mxu1 %v3448_v58  ;;  %v3514_v29 = vld [vmem:[#allocation5 + $0x180] sm:$0xff]   ;;  %v3464_v31 = vld [vmem:[#allocation2 + $0x234] ss:$28 sps:$4 sm:$0xff]  }
  0x4b   :  { %3039 = vmatpush3.bf16.msra.mxu0 %v3399_v37  ;;  %1262 = vmatprep.mubr.bf16.mxu0 %v3400_v38  ;;  %v3471_v36 = vld [vmem:[#allocation2 + $0x238] ss:$28 sps:$4 sm:$0xff]   ;;  %v3474_v38 = vld [vmem:[#allocation2 + $0x268] ss:$28 sps:$4 sm:$0xff]  }
  0x4c   :  { %1416 = vmatmul.mubr.bf16.vlgmr.msra.gmra.mxu1 %v3396_v35  ;;  %3040 = vmatprep.subr.bf16.mxu0 %v3409_v42  ;;  %v3472_v35 = vld [vmem:[#allocation2 + $0x26c] ss:$28 sps:$4 sm:$0xff]   ;;  %v3475_v37 = vld [vmem:[#allocation2 + $0x274] ss:$28 sps:$4 sm:$0xff]   ;;  %v3481_v42 = vld [vmem:[#allocation2 + $0x2a0] ss:$28 sps:$4 sm:$0xff]  }
  0x4d   :  { %1423 = vmatprep.mubr.bf16.mxu1 %v3403_v39  ;;  %3223 = vmatpush3.bf16.msra.mxu1 %v3448_v58  ;;  %v3479_v39 = vld [vmem:[#allocation2 + $0x2a4] ss:$28 sps:$4 sm:$0xff]   ;;  %v3511_v58 = vld [vmem:[#allocation2 + $0x10] ss:$28 sps:$4 sm:$0xff]  }
  0x4e   :  { %3224 = vmatprep.subr.bf16.mxu1 %v3463_v1 }
  0x4f   :  { %3041 = vmatpush3.bf16.msra.mxu0 %v3412_v45  ;;  %v3490_v45 = vld [vmem:[#allocation2 + $0x2e4] ss:$28 sps:$4 sm:$0xff]  }
  0x50   :  { %3042 = vmatprep.subr.bf16.mxu0 %v3423_v48  ;;  %v3492_v48 = vld [vmem:[#allocation2 + $0x2e0] ss:$28 sps:$4 sm:$0xff]  }
  0x51   :  { %3225 = vmatpush3.bf16.msra.mxu1 %v3463_v1  ;;  %v3531_v1 = vld [vmem:[#allocation2 + $0xf8] ss:$28 sps:$4 sm:$0xff]  }
  0x52   :  { %1263 = vmatmul.mubr.bf16.gmra.mxu0 %v3402_v40  ;;  %3226 = vmatprep.subr.bf16.mxu1 %v3478_v8  ;;  %v3477_v40 = vld [vmem:[#allocation2 + $0x270] ss:$28 sps:$4 sm:$0xff]  }
  0x53   :  { %1270 = vmatprep.mubr.bf16.mxu0 %v3406_v41  ;;  %3043 = vmatpush3.bf16.msra.mxu0 %v3426_v50  ;;  %v3483_v41 = vld [vmem:[#allocation2 + $0x2ac] ss:$28 sps:$4 sm:$0xff]  }
  0x54   :  { %1424 = vmatmul.mubr.bf16.gmra.mxu1 %v3405_v43  ;;  %3044 = vmatprep.subr.bf16.mxu0 %v3437_v54  ;;  %v3487_v43 = vld [vmem:[#allocation2 + $0x2dc] ss:$28 sps:$4 sm:$0xff]   ;;  %v3496_v50 = vld [vmem:[#allocation2 + $0x310] ss:$28 sps:$4 sm:$0xff]   ;;  %v3505_v54 = vld [vmem:[#allocation2 + $0x348] ss:$28 sps:$4 sm:$0xff]  }
  0x55   :  { %1431 = vmatprep.mubr.bf16.mxu1 %v3410_v44  ;;  %3227 = vmatpush3.bf16.msra.mxu1 %v3478_v8  ;;  %v3486_v44 = vld [vmem:[#allocation2 + $0x2a8] ss:$28 sps:$4 sm:$0xff]   ;;  %v3540_v8 = vld [vmem:[#allocation2 + $0x1a0] ss:$28 sps:$4 sm:$0xff]  }
  0x56   :  { %3228 = vmatprep.subr.bf16.mxu1 %v3493_v16 }
  0x57   :  { %3045 = vmatpush3.bf16.msra.mxu0 %v3440_v56  ;;  %v3509_v56 = vld [vmem:[#allocation2 + $0x350] ss:$28 sps:$4 sm:$0xff]  }
  0x58   :  { %3046 = vmatprep.subr.bf16.mxu0 %v3452_v61  ;;  %v3523_v61 = vld [vmem:[#allocation2 + $0x88] ss:$28 sps:$4 sm:$0xff]  }
  0x59   :  { %3229 = vmatpush3.bf16.msra.mxu1 %v3493_v16  ;;  %v3556_v16 = vld [vmem:[#allocation2 + $0x280] ss:$28 sps:$4 sm:$0xff]  }
  0x5a   :  { %1271 = vmatmul.mubr.bf16.gmra.mxu0 %v3408_v46  ;;  %3230 = vmatprep.subr.bf16.mxu1 %v3502_v22  ;;  %v3489_v46 = vld [vmem:[#allocation2 + $0x2d8] ss:$28 sps:$4 sm:$0xff]  }
  0x5b   :  { %1278 = vmatprep.mubr.bf16.mxu0 %v3414_v47  ;;  %3047 = vmatpush3.bf16.msra.mxu0 %v3455_v63  ;;  %v3494_v47 = vld [vmem:[#allocation2 + $0x314] ss:$28 sps:$4 sm:$0xff]   ;;  %v3520_v63 = vld [vmem:[#allocation2 + $0x84] ss:$28 sps:$4 sm:$0xff]  }
  0x5c   :  { %1432 = vmatmul.mubr.bf16.gmra.mxu1 %v3413_v49  ;;  %3048 = vmatprep.subr.bf16.mxu0 %v3467_v4  ;;  %v3498_v49 = vld [vmem:[#allocation2 + $0x31c] ss:$28 sps:$4 sm:$0xff]   ;;  %v3532_v4 = vld [vmem:[#allocation2 + $0x130] ss:$28 sps:$4 sm:$0xff]  }
  0x5d   :  { %1439 = vmatprep.mubr.bf16.mxu1 %v3417_v51  ;;  %3231 = vmatpush3.bf16.msra.mxu1 %v3502_v22  ;;  %v3503_v51 = vld [vmem:[#allocation2 + $0x34c] ss:$28 sps:$4 sm:$0xff]   ;;  %v3543_v22 = vld [vmem:[#allocation2 + $0x198] ss:$28 sps:$4 sm:$0xff]  }
  0x5e   :  { %3232 = vmatprep.subr.bf16.mxu1 %v3506_v24 }
  0x5f   :  { %3049 = vmatpush3.bf16.msra.mxu0 %v3470_v6  ;;  %v3527_v6 = vld [vmem:[#allocation2 + $0xb8] ss:$28 sps:$4 sm:$0xff]  }
  0x60   :  { %3050 = vmatprep.subr.bf16.mxu0 %v3482_v11  ;;  %v3533_v11 = vld [vmem:[#allocation2 + $0x12c] ss:$28 sps:$4 sm:$0xff]  }
  0x61   :  { %3233 = vmatpush3.bf16.msra.mxu1 %v3506_v24  ;;  %v3572_v24 = vld [vmem:[#allocation2 + $0x360] ss:$28 sps:$4 sm:$0xff]  }
  0x62   :  { %1279 = vmatmul.mubr.bf16.gmra.mxu0 %v3416_v52  ;;  %3234 = vmatprep.subr.bf16.mxu1 %v3510_v26  ;;  %v3501_v52 = vld [vmem:[#allocation2 + $0x318] ss:$28 sps:$4 sm:$0xff]  }
  0x63   :  { %1286 = vmatprep.mubr.bf16.mxu0 %v3420_v53  ;;  %3051 = vmatpush3.bf16.msra.mxu0 %v3485_v14  ;;  %v3507_v53 = vld [vmem:[#allocation2 + $0x354] ss:$28 sps:$4 sm:$0xff]   ;;  %v3535_v14 = vld [vmem:[#allocation2 + $0x128] ss:$28 sps:$4 sm:$0xff]  }
  0x64   :  { %1440 = vmatmul.mubr.bf16.gmra.mxu1 %v3419_v55  ;;  %3052 = vmatprep.subr.bf16.mxu0 %v3497_v18  ;;  %v3513_v55 = vld [vmem:[#allocation2 + $0x14] ss:$28 sps:$4 sm:$0xff]   ;;  %v3538_v18 = vld [vmem:[#allocation2 + $0x160] ss:$28 sps:$4 sm:$0xff]  }
  0x65   :  { %1447 = vmatprep.mubr.bf16.mxu1 %v3424_v57  ;;  %3235 = vmatpush3.bf16.msra.mxu1 %v3510_v26  ;;  %v3515_v57 = vld [vmem:[#allocation2 + $0x18] ss:$28 sps:$4 sm:$0xff]   ;;  %v3549_v26 = vld [vmem:[#allocation2 + $0x20c] ss:$28 sps:$4 sm:$0xff]  }
  0x66   :  { %3236 = vmatprep.subr.bf16.mxu1 %v3514_v29 }
  0x67   :  { %3053 = vmatpush3.bf16.msra.mxu0 %v3500_v21  ;;  %v3571_v21 = vld [vmem:[#allocation2 + $0x328] ss:$28 sps:$4 sm:$0xff]  }
  0x69   :  { %3237 = vmatpush3.bf16.msra.mxu1 %v3514_v29 }
  0x6a   :  { %1287 = vmatmul.mubr.bf16.gmra.mxu0 %v3422_v59  ;;  %v3517_v59 = vld [vmem:[#allocation2 + $0x4c] ss:$28 sps:$4 sm:$0xff]  }
  0x6b   :  { %1294 = vmatprep.mubr.bf16.mxu0 %v3428_v60  ;;  %v3516_v60 = vld [vmem:[#allocation2 + $0x50] ss:$28 sps:$4 sm:$0xff]  }
  0x6c   :  { %1448 = vmatmul.mubr.bf16.gmra.mxu1 %v3427_v62  ;;  %v3519_v62 = vld [vmem:[#allocation2 + $0x48] ss:$28 sps:$4 sm:$0xff]  }
  0x6d   :  { %1455 = vmatprep.mubr.bf16.mxu1 %v3431_v0  ;;  %v3524_v0 = vld [vmem:[#allocation2 + $0xc0] ss:$28 sps:$4 sm:$0xff]  }
  0x72   :  { %1295 = vmatmul.mubr.bf16.gmra.mxu0 %v3430_v2  ;;  %v3522_v2 = vld [vmem:[#allocation2 + $0x80] ss:$28 sps:$4 sm:$0xff]  }
  0x73   :  { %1302 = vmatprep.mubr.bf16.mxu0 %v3434_v3  ;;  %v3525_v3 = vld [vmem:[#allocation2 + $0xbc] ss:$28 sps:$4 sm:$0xff]  }
  0x74   :  { %1456 = vmatmul.mubr.bf16.gmra.mxu1 %v3433_v5  ;;  %v3539_v5 = vld [vmem:[#allocation2 + $0x168] ss:$28 sps:$4 sm:$0xff]  }
  0x75   :  { %1463 = vmatprep.mubr.bf16.mxu1 %v3438_v7  ;;  %v3528_v7 = vld [vmem:[#allocation2 + $0xf4] ss:$28 sps:$4 sm:$0xff]  }
  0x7a   :  { %1303 = vmatmul.mubr.bf16.gmra.mxu0 %v3436_v9  ;;  %v3547_v9 = vld [vmem:[#allocation2 + $0x1d8] ss:$28 sps:$4 sm:$0xff]  }
  0x7b   :  { %1310 = vmatprep.mubr.bf16.mxu0 %v3442_v10  ;;  %v3530_v10 = vld [vmem:[#allocation2 + $0xf0] ss:$28 sps:$4 sm:$0xff]  }
  0x7c   :  { %1464 = vmatmul.mubr.bf16.gmra.mxu1 %v3441_v12  ;;  %v3548_v12 = vld [vmem:[#allocation2 + $0x210] ss:$28 sps:$4 sm:$0xff]  }
  0x7d   :  { %1471 = vmatprep.mubr.bf16.mxu1 %v3445_v13  ;;  %v3555_v13 = vld [vmem:[#allocation2 + $0x248] ss:$28 sps:$4 sm:$0xff]  }
  0x82   :  { %1311 = vmatmul.mubr.bf16.gmra.mxu0 %v3444_v15  ;;  %v3536_v15 = vld [vmem:[#allocation2 + $0x164] ss:$28 sps:$4 sm:$0xff]  }
  0x83   :  { %1318 = vmatprep.mubr.bf16.mxu0 %v3449_v17  ;;  %v3563_v17 = vld [vmem:[#allocation2 + $0x2b8] ss:$28 sps:$4 sm:$0xff]  }
  0x84   :  { %1472 = vmatmul.mubr.bf16.gmra.mxu1 %v3447_v19  ;;  %v3541_v19 = vld [vmem:[#allocation2 + $0x19c] ss:$28 sps:$4 sm:$0xff]  }
  0x85   :  { %1479 = vmatprep.mubr.bf16.mxu1 %v3453_v20  ;;  %v3564_v20 = vld [vmem:[#allocation2 + $0x2f0] ss:$28 sps:$4 sm:$0xff]  }
  0x8a   :  { %1319 = vmatmul.mubr.bf16.gmra.mxu0 %v3451_v23  ;;  %v3544_v23 = vld [vmem:[#allocation2 + $0x1d4] ss:$28 sps:$4 sm:$0xff]  }
  0x8b   :  { %1326 = vmatprep.mubr.bf16.mxu0 %v3457_v25  ;;  %v3546_v25 = vld [vmem:[#allocation2 + $0x1d0] ss:$28 sps:$4 sm:$0xff]  }
  0x8c   :  { %1480 = vmatmul.mubr.bf16.gmra.mxu1 %v3456_v27 }
  0x8d   :  { %1487 = vmatprep.mubr.bf16.mxu1 %v3460_v28  ;;  %v3973_v28 = vld [vmem:[%s4416_s2] ss:$0 sm:$0xff] }
  0x92   :  { %1327 = vmatmul.mubr.bf16.gmra.mxu0 %v3459_v30 }
  0x93   :  { %1334 = vmatprep.mubr.bf16.mxu0 %v3464_v31 }
  0x94   :  { %1488 = vmatmul.mubr.bf16.gmra.mxu1 %v3462_v32 }
  0x95   :  { %1495 = vmatprep.mubr.bf16.mxu1 %v3468_v33  ;;  %v3551_v33 = vld [vmem:[#allocation2 + $0x208] ss:$28 sps:$4 sm:$0xff]  }
  0x9a   :  { %1335 = vmatmul.mubr.bf16.gmra.mxu0 %v3466_v34 }
  0x9b   :  { %1342 = vmatprep.mubr.bf16.mxu0 %v3472_v35 }
  0x9c   :  { %1496 = vmatmul.mubr.bf16.gmra.mxu1 %v3471_v36  ;;  %v3552_v36 = vld [vmem:[#allocation2 + $0x244] ss:$28 sps:$4 sm:$0xff]  }
  0x9d   :  { %1503 = vmatprep.mubr.bf16.mxu1 %v3475_v37 }
  0xa2   :  { %1343 = vmatmul.mubr.bf16.gmra.mxu0 %v3474_v38 }
  0xa3   :  { %1350 = vmatprep.mubr.bf16.mxu0 %v3479_v39 }
  0xa4   :  { %1504 = vmatmul.mubr.bf16.gmra.mxu1 %v3477_v40 }
  0xa5   :  { %1511 = vmatprep.mubr.bf16.mxu1 %v3483_v41 }
  0xaa   :  { %1351 = vmatmul.mubr.bf16.gmra.mxu0 %v3481_v42 }
  0xab   :  { %1358 = vmatprep.mubr.bf16.mxu0 %v3487_v43 }
  0xac   :  { %1512 = vmatmul.mubr.bf16.gmra.mxu1 %v3486_v44 }
  0xad   :  { %1519 = vmatprep.mubr.bf16.mxu1 %v3490_v45 }
  0xb2   :  { %1359 = vmatmul.mubr.bf16.gmra.mxu0 %v3489_v46 }
  0xb3   :  { %1366 = vmatprep.mubr.bf16.mxu0 %v3494_v47 }
  0xb4   :  { %1520 = vmatmul.mubr.bf16.gmra.mxu1 %v3492_v48 }
  0xb5   :  { %1527 = vmatprep.mubr.bf16.mxu1 %v3498_v49 }
  0xba   :  { %1367 = vmatmul.mubr.bf16.gmra.mxu0 %v3496_v50 }
  0xbb   :  { %1374 = vmatprep.mubr.bf16.mxu0 %v3503_v51  ;;  %v3554_v51 = vld [vmem:[#allocation2 + $0x240] ss:$28 sps:$4 sm:$0xff]  }
  0xbc   :  { %1528 = vmatmul.mubr.bf16.gmra.mxu1 %v3501_v52 }
  0xbd   :  { %1535 = vmatprep.mubr.bf16.mxu1 %v3507_v53 }
  0xc2   :  { %1375 = vmatmul.mubr.bf16.gmra.mxu0 %v3505_v54  ;;  %v3557_v54 = vld [vmem:[#allocation2 + $0x27c] ss:$28 sps:$4 sm:$0xff]  }
  0xc3   :  { %1576 = vmatprep.mubr.bf16.mxu0 %v3513_v55 }
  0xc4   :  { %1536 = vmatmul.mubr.bf16.gmra.mxu1 %v3509_v56 }
  0xc5   :  { %3238 = vmatprep.mubr.bf16.mxu1 %v3515_v57 }
  0xca   :  { %1577 = vmatmul.mubr.bf16.vlgmr.msra.gmra.mxu0 %v3511_v58 }
  0xcb   :  { %1584 = vmatprep.mubr.bf16.mxu0 %v3517_v59  ;;  %v2041_v59 = vld [vmem:[#allocation7 + $0x78] sm:$0xff] }
  0xcc   :  { %3239 = vmatmul.mubr.bf16.vlgmr.msra.gmra.mxu1 %v3516_v60  ;;  %3270 = vmatprep.subr.mxu1 %v2041_v59 }
  0xcd   :  { %3242 = vmatprep.mubr.bf16.mxu1 %v3523_v61  ;;  %3271 = vmatpush3.msra.mxu1 %v2041_v59  ;;  %v2030_v59 = vld [vmem:[#allocation7 + $0x20] sm:$0xff] }
  0xd2   :  { %1585 = vmatmul.mubr.bf16.gmra.mxu0 %v3519_v62 }
  0xd3   :  { %1592 = vmatprep.mubr.bf16.mxu0 %v3520_v63 }
  0xd4   :  { %3243 = vmatmul.mubr.bf16.gmra.mxu1 %v3524_v0  ;;  %v2040_v0 = vld [vmem:[#allocation7 + $0x70] sm:$0xff] }
  0xd5   :  { %3246 = vmatprep.mubr.bf16.mxu1 %v3531_v1  ;;  %3272 = vmatprep.subr.mxu1 %v2040_v0 }
  0xd6   :  { %3273 = vmatpush3.msra.mxu1 %v2040_v0 }
  0xda   :  { %1593 = vmatmul.mubr.bf16.gmra.mxu0 %v3522_v2 }
  0xdb   :  { %1600 = vmatprep.mubr.bf16.mxu0 %v3525_v3 }
  0xdc   :  { %3247 = vmatmul.mubr.bf16.gmra.mxu1 %v3532_v4 }
  0xdd   :  { %3250 = vmatprep.mubr.bf16.mxu1 %v3539_v5  ;;  %v2039_v5 = vld [vmem:[#allocation7 + $0x68] sm:$0xff] }
  0xde   :  { %3274 = vmatprep.subr.mxu1 %v2039_v5 }
  0xdf   :  { %3275 = vmatpush3.msra.mxu1 %v2039_v5 }
  0xe2   :  { %1601 = vmatmul.mubr.bf16.gmra.mxu0 %v3527_v6 }
  0xe3   :  { %1608 = vmatprep.mubr.bf16.mxu0 %v3528_v7 }
  0xe4   :  { %3251 = vmatmul.mubr.bf16.gmra.mxu1 %v3540_v8  ;;  %v3559_v8 = vld [vmem:[#allocation2 + $0x278] ss:$28 sps:$4 sm:$0xff]  }
  0xe5   :  { %3254 = vmatprep.mubr.bf16.mxu1 %v3547_v9 }
  0xea   :  { %1609 = vmatmul.mubr.bf16.gmra.mxu0 %v3530_v10 }
  0xeb   :  { %1616 = vmatprep.mubr.bf16.mxu0 %v3533_v11  ;;  %v3562_v11 = vld [vmem:[#allocation2 + $0x2b4] ss:$28 sps:$4 sm:$0xff]  }
  0xec   :  { %3255 = vmatmul.mubr.bf16.gmra.mxu1 %v3548_v12  ;;  %v2038_v12 = vld [vmem:[#allocation7 + $0x60] sm:$0xff] }
  0xed   :  { %3258 = vmatprep.mubr.bf16.mxu1 %v3555_v13  ;;  %3276 = vmatprep.subr.mxu1 %v2038_v12 }
  0xee   :  { %3277 = vmatpush3.msra.mxu1 %v2038_v12  ;;  %v2027_v12 = vld [vmem:[#allocation7 + $0x8] sm:$0xff] }
  0xf2   :  { %1617 = vmatmul.mubr.bf16.gmra.mxu0 %v3535_v14 }
  0xf3   :  { %1624 = vmatprep.mubr.bf16.mxu0 %v3536_v15 }
  0xf4   :  { %3259 = vmatmul.mubr.bf16.gmra.mxu1 %v3556_v16 }
  0xf5   :  { %3262 = vmatprep.mubr.bf16.mxu1 %v3563_v17  ;;  %v2037_v17 = vld [vmem:[#allocation7 + $0x58] sm:$0xff] }
  0xf6   :  { %3278 = vmatprep.subr.mxu1 %v2037_v17 }
  0xf7   :  { %3279 = vmatpush3.msra.mxu1 %v2037_v17 }
  0xfa   :  { %1625 = vmatmul.mubr.bf16.gmra.mxu0 %v3538_v18 }
  0xfb   :  { %1632 = vmatprep.mubr.bf16.mxu0 %v3541_v19 }
  0xfc   :  { %3263 = vmatmul.mubr.bf16.gmra.mxu1 %v3564_v20 }
  0xfd   :  { %3266 = vmatprep.mubr.bf16.mxu1 %v3571_v21 }
 0x102   :  { %1633 = vmatmul.mubr.bf16.gmra.mxu0 %v3543_v22  ;;  %v2036_v22 = vld [vmem:[#allocation7 + $0x50] sm:$0xff] }
 0x103   :  { %1640 = vmatprep.mubr.bf16.mxu0 %v3544_v23  ;;  %3280 = vmatprep.subr.mxu1 %v2036_v22 }
 0x104   :  { %3267 = vmatmul.mubr.bf16.gmra.mxu1 %v3572_v24 }
 0x105   :  { %3281 = vmatpush3.msra.mxu1 %v2036_v22 }
 0x10a   :  { %v2830_v27 = vpop.f32.mrf.mxu0  ;;  %1641 = vmatmul.mubr.bf16.gmra.mxu0 %v3546_v25 }
 0x10b   :  { %1648 = vmatprep.mubr.bf16.mxu0 %v3549_v26 }
 0x10c   :  { %v2831_v29 = vpop.f32.mrf.mxu0  ;;  %v2942_v31 = vpop.f32.mrf.mxu1 }
 0x10d   :  { %v2832_v30 = vadd.f32 %v2831_v29, %v2830_v27  ;;  %v2035_v27 = vld [vmem:[#allocation7 + $0x48] sm:$0xff] }
 0x10e   :  { %v2833_v32 = vpop.f32.mrf.mxu0  ;;  %v2943_v35 = vpop.f32.mrf.mxu1  ;;  %3282 = vmatprep.subr.mxu1 %v2035_v27 }
 0x10f   :  { %v1257_v34 = vadd.f32 %v2832_v30, %v3973_v28  ;;  %v2944_v37 = vadd.f32 %v2943_v35, %v2942_v31  ;;  %v3560_v31 = vld [vmem:[#allocation2 + $0x2b0] ss:$28 sps:$4 sm:$0xff]   ;;  %3283 = vmatpush3.msra.mxu1 %v2035_v27  ;;  %v2034_v35 = vld [vmem:[#allocation7 + $0x40] sm:$0xff] }
 0x110   :  { %v2834_v38 = vpop.f32.mrf.mxu0  ;;  %v2945_v40 = vpop.f32.mrf.mxu1  ;;  %3284 = vmatprep.subr.mxu1 %v2034_v35 }
 0x111   :  { %v2835_v39 = vadd.f32 %v2834_v38, %v2833_v32  ;;  %v3976_v41 = vadd.f32 %v2944_v37, %v1257_v34  ;;  %v3567_v34 = vld [vmem:[#allocation2 + $0x2ec] ss:$28 sps:$4 sm:$0xff]   ;;  %3285 = vmatpush3.msra.mxu1 %v2034_v35 }
 0x112   :  { %v2836_v42 = vpop.f32.mrf.mxu0  ;;  %1649 = vmatmul.mubr.bf16.gmra.mxu0 %v3551_v33  ;;  %v2946_v44 = vpop.f32.mrf.mxu1 }
 0x113   :  { %v1260_v43 = vadd.f32 %v2835_v39, %v3973_v28  ;;  %1656 = vmatprep.mubr.bf16.mxu0 %v3552_v36  ;;  %v2947_v45 = vadd.f32 %v2946_v44, %v2945_v40  ;;  %v2033_v40 = vld [vmem:[#allocation7 + $0x38] sm:$0xff] }
 0x114   :  { %v2837_v46 = vpop.f32.mrf.mxu0  ;;  %v2948_v48 = vpop.f32.mrf.mxu1  ;;  %3286 = vmatprep.subr.mxu1 %v2033_v40 }
 0x115   :  { %v2838_v47 = vadd.f32 %v2837_v46, %v2836_v42  ;;  %v3979_v49 = vadd.f32 %v2947_v45, %v1260_v43  ;;  %3287 = vmatpush3.msra.mxu1 %v2033_v40  ;;  %v2032_v46 = vld [vmem:[#allocation7 + $0x30] sm:$0xff] }
 0x116   :  { %v2839_v50 = vpop.f32.mrf.mxu0  ;;  %v2949_v53 = vpop.f32.mrf.mxu1  ;;  %3288 = vmatprep.subr.mxu1 %v2032_v46 }
 0x117   :  { %v1265_v52 = vadd.f32 %v2838_v47, %v3973_v28  ;;  %v2950_v55 = vadd.f32 %v2949_v53, %v2948_v48  ;;  %3289 = vmatpush3.msra.mxu1 %v2032_v46 }
 0x118   :  { %v2840_v56 = vpop.f32.mrf.mxu0  ;;  %v2951_v58 = vpop.f32.mrf.mxu1 }
 0x119   :  { %v2841_v57 = vadd.f32 %v2840_v56, %v2839_v50  ;;  %v3982_v60 = vadd.f32 %v2950_v55, %v1265_v52  ;;  %v2031_v52 = vld [vmem:[#allocation7 + $0x28] sm:$0xff] }
 0x11a   :  { %v2842_v61 = vpop.f32.mrf.mxu0  ;;  %1657 = vmatmul.mubr.bf16.gmra.mxu0 %v3554_v51  ;;  %v2952_v63 = vpop.f32.mrf.mxu1  ;;  %v3565_v55 = vld [vmem:[#allocation2 + $0x2e8] ss:$28 sps:$4 sm:$0xff]   ;;  %3290 = vmatprep.subr.mxu1 %v2031_v52 }
 0x11b   :  { %v1268_v62 = vadd.f32 %v2841_v57, %v3973_v28  ;;  %1664 = vmatprep.mubr.bf16.mxu0 %v3557_v54  ;;  %v2953_v1 = vadd.f32 %v2952_v63, %v2951_v58  ;;  %v3570_v58 = vld [vmem:[#allocation2 + $0x324] ss:$28 sps:$4 sm:$0xff]   ;;  %3291 = vmatpush3.msra.mxu1 %v2031_v52 }
 0x11c   :  { %v2843_v2 = vpop.f32.mrf.mxu0  ;;  %v2954_v4 = vpop.f32.mrf.mxu1  ;;  %3292 = vmatprep.subr.mxu1 %v2030_v59 }
 0x11d   :  { %v2844_v3 = vadd.f32 %v2843_v2, %v2842_v61  ;;  %v3985_v6 = vadd.f32 %v2953_v1, %v1268_v62  ;;  %3293 = vmatpush3.msra.mxu1 %v2030_v59  ;;  %v2029_v1 = vld [vmem:[#allocation7 + $0x18] sm:$0xff] }
 0x11e   :  { %v2845_v7 = vpop.f32.mrf.mxu0  ;;  %v2955_v10 = vpop.f32.mrf.mxu1  ;;  %3294 = vmatprep.subr.mxu1 %v2029_v1 }
 0x11f   :  { %v1273_v9 = vadd.f32 %v2844_v3, %v3973_v28  ;;  %v2956_v13 = vadd.f32 %v2955_v10, %v2954_v4  ;;  %3295 = vmatpush3.msra.mxu1 %v2029_v1 }
 0x120   :  { %v2846_v14 = vpop.f32.mrf.mxu0  ;;  %v2957_v16 = vpop.f32.mrf.mxu1 }
 0x121   :  { %v2847_v15 = vadd.f32 %v2846_v14, %v2845_v7  ;;  %v3988_v18 = vadd.f32 %v2956_v13, %v1273_v9  ;;  %v2028_v7 = vld [vmem:[#allocation7 + $0x10] sm:$0xff] }
 0x122   :  { %v2848_v19 = vpop.f32.mrf.mxu0  ;;  %1665 = vmatmul.mubr.bf16.gmra.mxu0 %v3559_v8  ;;  %v2958_v21 = vpop.f32.mrf.mxu1  ;;  %3296 = vmatprep.subr.mxu1 %v2028_v7 }
 0x123   :  { %v1276_v20 = vadd.f32 %v2847_v15, %v3973_v28  ;;  %1672 = vmatprep.mubr.bf16.mxu0 %v3562_v11  ;;  %v2959_v23 = vadd.f32 %v2958_v21, %v2957_v16  ;;  %3297 = vmatpush3.msra.mxu1 %v2028_v7  ;;  %v3568_v15 = vld [vmem:[#allocation2 + $0x320] ss:$28 sps:$4 sm:$0xff]  }
 0x124   :  { %v2849_v24 = vpop.f32.mrf.mxu0  ;;  %v2960_v26 = vpop.f32.mrf.mxu1  ;;  %3298 = vmatprep.subr.mxu1 %v2027_v12 }
 0x125   :  { %v2850_v25 = vadd.f32 %v2849_v24, %v2848_v19  ;;  %v3991_v29 = vadd.f32 %v2959_v23, %v1276_v20  ;;  %v3575_v19 = vld [vmem:[#allocation2 + $0x35c] ss:$28 sps:$4 sm:$0xff]   ;;  %3299 = vmatpush3.msra.mxu1 %v2027_v12  ;;  %v2026_v20 = vld [vmem:[#allocation7] sm:$0xff] }
 0x126   :  { %v2851_v30 = vpop.f32.mrf.mxu0  ;;  %v2961_v33 = vpop.f32.mrf.mxu1  ;;  %3300 = vmatprep.subr.mxu1 %v2026_v20 }
 0x127   :  { %v1281_v32 = vadd.f32 %v2850_v25, %v3973_v28  ;;  %v2962_v36 = vadd.f32 %v2961_v33, %v2960_v26  ;;  %3301 = vmatpush3.msra.mxu1 %v2026_v20 }
 0x128   :  { %v2852_v37 = vpop.f32.mrf.mxu0  ;;  %v2963_v39 = vpop.f32.mrf.mxu1 }
 0x129   :  { %v2853_v38 = vadd.f32 %v2852_v37, %v2851_v30  ;;  %v3994_v42 = vadd.f32 %v2962_v36, %v1281_v32  ;;  %v3573_v37 = vld [vmem:[#allocation2 + $0x358] ss:$28 sps:$4 sm:$0xff]  }
 0x12a   :  { %v2854_v43 = vpop.f32.mrf.mxu0  ;;  %1673 = vmatmul.mubr.bf16.gmra.mxu0 %v3560_v31  ;;  %v2964_v45 = vpop.f32.mrf.mxu1 }
 0x12b   :  { %v1284_v44 = vadd.f32 %v2853_v38, %v3973_v28  ;;  %1680 = vmatprep.mubr.bf16.mxu0 %v3567_v34  ;;  %v2965_v47 = vadd.f32 %v2964_v45, %v2963_v39 }
 0x12c   :  { %v2855_v48 = vpop.f32.mrf.mxu0  ;;  %v2966_v51 = vpop.f32.mrf.mxu1 }
 0x12d   :  { %v2856_v50 = vadd.f32 %v2855_v48, %v2854_v43  ;;  %v3997_v53 = vadd.f32 %v2965_v47, %v1284_v44 }
 0x12e   :  { %v2857_v54 = vpop.f32.mrf.mxu0  ;;  %v2967_v57 = vpop.f32.mrf.mxu1 }
 0x12f   :  { %v1289_v56 = vadd.f32 %v2856_v50, %v3973_v28  ;;  %v2968_v61 = vadd.f32 %v2967_v57, %v2966_v51 }
 0x130   :  { %v2858_v62 = vpop.f32.mrf.mxu0  ;;  %v2969_v0 = vpop.f32.mrf.mxu1 }
 0x131   :  { %v2859_v63 = vadd.f32 %v2858_v62, %v2857_v54  ;;  %v4000_v2 = vadd.f32 %v2968_v61, %v1289_v56 }
 0x132   :  { %v2860_v3 = vpop.f32.mrf.mxu0  ;;  %1681 = vmatmul.mubr.bf16.gmra.mxu0 %v3565_v55  ;;  %v2970_v5 = vpop.f32.mrf.mxu1 }
 0x133   :  { %v1292_v4 = vadd.f32 %v2859_v63, %v3973_v28  ;;  %1688 = vmatprep.mubr.bf16.mxu0 %v3570_v58  ;;  %v2971_v8 = vadd.f32 %v2970_v5, %v2969_v0 }
 0x134   :  { %v2861_v9 = vpop.f32.mrf.mxu0  ;;  %v2972_v11 = vpop.f32.mrf.mxu1 }
 0x135   :  { %v2862_v10 = vadd.f32 %v2861_v9, %v2860_v3  ;;  %v4003_v13 = vadd.f32 %v2971_v8, %v1292_v4 }
 0x136   :  { %v2863_v14 = vpop.f32.mrf.mxu0  ;;  %v2973_v17 = vpop.f32.mrf.mxu1 }
 0x137   :  { %v1297_v16 = vadd.f32 %v2862_v10, %v3973_v28  ;;  %v2974_v21 = vadd.f32 %v2973_v17, %v2972_v11 }
 0x138   :  { %v2864_v22 = vpop.f32.mrf.mxu0  ;;  %v2975_v24 = vpop.f32.mrf.mxu1 }
 0x139   :  { %v2865_v23 = vadd.f32 %v2864_v22, %v2863_v14  ;;  %v4006_v25 = vadd.f32 %v2974_v21, %v1297_v16 }
 0x13a   :  { %v2866_v26 = vpop.f32.mrf.mxu0  ;;  %1689 = vmatmul.mubr.bf16.gmra.mxu0 %v3568_v15  ;;  %v2976_v30 = vpop.f32.mrf.mxu1 }
 0x13b   :  { %v1300_v27 = vadd.f32 %v2865_v23, %v3973_v28  ;;  %1696 = vmatprep.mubr.bf16.mxu0 %v3575_v19  ;;  %v2977_v31 = vadd.f32 %v2976_v30, %v2975_v24 }
 0x13c   :  { %v2867_v32 = vpop.f32.mrf.mxu0  ;;  %v2978_v34 = vpop.f32.mrf.mxu1 }
 0x13d   :  { %v2868_v33 = vadd.f32 %v2867_v32, %v2866_v26  ;;  %v4009_v35 = vadd.f32 %v2977_v31, %v1300_v27 }
 0x13e   :  { %v2869_v36 = vpop.f32.mrf.mxu0  ;;  %v2979_v39 = vpop.f32.mrf.mxu1 }
 0x13f   :  { %v1305_v38 = vadd.f32 %v2868_v33, %v3973_v28  ;;  %v2980_v40 = vadd.f32 %v2979_v39, %v2978_v34 }
 0x140   :  { %v2870_v43 = vpop.f32.mrf.mxu0  ;;  %v2981_v45 = vpop.f32.mrf.mxu1 }
 0x141   :  { %v2871_v44 = vadd.f32 %v2870_v43, %v2869_v36  ;;  %v4012_v46 = vadd.f32 %v2980_v40, %v1305_v38 }
 0x142   :  { %v2872_v47 = vpop.f32.mrf.mxu0  ;;  %1697 = vmatmul.mubr.bf16.gmra.mxu0 %v3573_v37  ;;  %v2982_v50 = vpop.f32.mrf.mxu1 }
 0x143   :  { %v1308_v48 = vadd.f32 %v2871_v44, %v3973_v28  ;;  %v2983_v51 = vadd.f32 %v2982_v50, %v2981_v45 }
 0x144   :  { %v2873_v52 = vpop.f32.mrf.mxu0  ;;  %v2984_v55 = vpop.f32.mrf.mxu1 }
 0x145   :  { %v2874_v54 = vadd.f32 %v2873_v52, %v2872_v47  ;;  %v4015_v56 = vadd.f32 %v2983_v51, %v1308_v48 }
 0x146   :  { %v2875_v57 = vpop.f32.mrf.mxu0  ;;  %v2985_v59 = vpop.f32.mrf.mxu1 }
 0x147   :  { %v1313_v58 = vadd.f32 %v2874_v54, %v3973_v28  ;;  %v2986_v61 = vadd.f32 %v2985_v59, %v2984_v55 }
 0x148   :  { %v2876_v62 = vpop.f32.mrf.mxu0  ;;  %v2987_v0 = vpop.f32.mrf.mxu1 }
 0x149   :  { %v2877_v63 = vadd.f32 %v2876_v62, %v2875_v57  ;;  %v4018_v1 = vadd.f32 %v2986_v61, %v1313_v58 }
 0x14a   :  { %v2878_v3 = vpop.f32.mrf.mxu0  ;;  %v2988_v5 = vpop.f32.mrf.mxu1 }
 0x14b   :  { %v1316_v4 = vadd.f32 %v2877_v63, %v3973_v28  ;;  %v2989_v7 = vadd.f32 %v2988_v5, %v2987_v0 }
 0x14c   :  { %v2879_v8 = vpop.f32.mrf.mxu0  ;;  %v2990_v10 = vpop.f32.mrf.mxu1 }
 0x14d   :  { %v2880_v9 = vadd.f32 %v2879_v8, %v2878_v3  ;;  %v4021_v11 = vadd.f32 %v2989_v7, %v1316_v4 }
 0x14e   :  { %v2881_v12 = vpop.f32.mrf.mxu0  ;;  %v2991_v15 = vpop.f32.mrf.mxu1 }
 0x14f   :  { %v1321_v14 = vadd.f32 %v2880_v9, %v3973_v28  ;;  %v2992_v16 = vadd.f32 %v2991_v15, %v2990_v10 }
 0x150   :  { %v2882_v17 = vpop.f32.mrf.mxu0  ;;  %v2993_v20 = vpop.f32.mrf.mxu1 }
 0x151   :  { %v2883_v19 = vadd.f32 %v2882_v17, %v2881_v12  ;;  %v4024_v21 = vadd.f32 %v2992_v16, %v1321_v14 }
 0x152   :  { %v2884_v22 = vpop.f32.mrf.mxu0  ;;  %v2994_v24 = vpop.f32.mrf.mxu1 }
 0x153   :  { %v1324_v23 = vadd.f32 %v2883_v19, %v3973_v28  ;;  %v2995_v26 = vadd.f32 %v2994_v24, %v2993_v20 }
 0x154   :  { %v2885_v27 = vpop.f32.mrf.mxu0  ;;  %v2996_v31 = vpop.f32.mrf.mxu1 }
 0x155   :  { %v2886_v30 = vadd.f32 %v2885_v27, %v2884_v22  ;;  %v4027_v32 = vadd.f32 %v2995_v26, %v1324_v23 }
 0x156   :  { %v2887_v33 = vpop.f32.mrf.mxu0  ;;  %v2997_v36 = vpop.f32.mrf.mxu1 }
 0x157   :  { %v1329_v34 = vadd.f32 %v2886_v30, %v3973_v28  ;;  %v2998_v37 = vadd.f32 %v2997_v36, %v2996_v31 }
 0x158   :  { %v2888_v38 = vpop.f32.mrf.mxu0  ;;  %v2999_v40 = vpop.f32.mrf.mxu1 }
 0x159   :  { %v2889_v39 = vadd.f32 %v2888_v38, %v2887_v33  ;;  %v4030_v43 = vadd.f32 %v2998_v37, %v1329_v34 }
 0x15a   :  { %v2890_v44 = vpop.f32.mrf.mxu0  ;;  %v3000_v47 = vpop.f32.mrf.mxu1 }
 0x15b   :  { %v1332_v45 = vadd.f32 %v2889_v39, %v3973_v28  ;;  %v3001_v48 = vadd.f32 %v3000_v47, %v2999_v40 }
 0x15c   :  { %v2891_v50 = vpop.f32.mrf.mxu0  ;;  %v3002_v52 = vpop.f32.mrf.mxu1 }
 0x15d   :  { %v2892_v51 = vadd.f32 %v2891_v50, %v2890_v44  ;;  %v4033_v54 = vadd.f32 %v3001_v48, %v1332_v45 }
 0x15e   :  { %v2893_v55 = vpop.f32.mrf.mxu0  ;;  %v3003_v58 = vpop.f32.mrf.mxu1 }
 0x15f   :  { %v1337_v57 = vadd.f32 %v2892_v51, %v3973_v28  ;;  %v3004_v59 = vadd.f32 %v3003_v58, %v3002_v52 }
 0x160   :  { %v2894_v61 = vpop.f32.mrf.mxu0  ;;  %v3005_v63 = vpop.f32.mrf.mxu1 }
 0x161   :  { %v2895_v62 = vadd.f32 %v2894_v61, %v2893_v55  ;;  %v4036_v0 = vadd.f32 %v3004_v59, %v1337_v57 }
 0x162   :  { %v2896_v3 = vpop.f32.mrf.mxu0  ;;  %v3006_v5 = vpop.f32.mrf.mxu1 }
 0x163   :  { %v1340_v4 = vadd.f32 %v2895_v62, %v3973_v28  ;;  %v3007_v7 = vadd.f32 %v3006_v5, %v3005_v63 }
 0x164   :  { %v2897_v8 = vpop.f32.mrf.mxu0  ;;  %v3008_v10 = vpop.f32.mrf.mxu1 }
 0x165   :  { %v2898_v9 = vadd.f32 %v2897_v8, %v2896_v3  ;;  %v4039_v12 = vadd.f32 %v3007_v7, %v1340_v4 }
 0x166   :  { %v2899_v14 = vpop.f32.mrf.mxu0  ;;  %v3009_v16 = vpop.f32.mrf.mxu1 }
 0x167   :  { %v1345_v15 = vadd.f32 %v2898_v9, %v3973_v28  ;;  %v3010_v17 = vadd.f32 %v3009_v16, %v3008_v10 }
 0x168   :  { %v2900_v19 = vpop.f32.mrf.mxu0  ;;  %v3011_v22 = vpop.f32.mrf.mxu1 }
 0x169   :  { %v2901_v20 = vadd.f32 %v2900_v19, %v2899_v14  ;;  %v4042_v23 = vadd.f32 %v3010_v17, %v1345_v15 }
 0x16a   :  { %v2902_v24 = vpop.f32.mrf.mxu0  ;;  %v3012_v27 = vpop.f32.mrf.mxu1 }
 0x16b   :  { %v1348_v26 = vadd.f32 %v2901_v20, %v3973_v28  ;;  %v3013_v30 = vadd.f32 %v3012_v27, %v3011_v22 }
 0x16c   :  { %v2903_v31 = vpop.f32.mrf.mxu0  ;;  %v3014_v34 = vpop.f32.mrf.mxu1 }
 0x16d   :  { %v2904_v33 = vadd.f32 %v2903_v31, %v2902_v24  ;;  %v4045_v36 = vadd.f32 %v3013_v30, %v1348_v26 }
 0x16e   :  { %v2905_v37 = vpop.f32.mrf.mxu0  ;;  %v3015_v39 = vpop.f32.mrf.mxu1 }
 0x16f   :  { %v1353_v38 = vadd.f32 %v2904_v33, %v3973_v28  ;;  %v3016_v40 = vadd.f32 %v3015_v39, %v3014_v34 }
 0x170   :  { %v2906_v44 = vpop.f32.mrf.mxu0  ;;  %v3017_v47 = vpop.f32.mrf.mxu1 }
 0x171   :  { %v2907_v45 = vadd.f32 %v2906_v44, %v2905_v37  ;;  %v4048_v48 = vadd.f32 %v3016_v40, %v1353_v38 }
 0x172   :  { %v2908_v50 = vpop.f32.mrf.mxu0  ;;  %v3018_v52 = vpop.f32.mrf.mxu1 }
 0x173   :  { %v1356_v51 = vadd.f32 %v2907_v45, %v3973_v28  ;;  %v3019_v55 = vadd.f32 %v3018_v52, %v3017_v47 }
 0x174   :  { %v2909_v57 = vpop.f32.mrf.mxu0  ;;  %v3020_v59 = vpop.f32.mrf.mxu1 }
 0x175   :  { %v2910_v58 = vadd.f32 %v2909_v57, %v2908_v50  ;;  %v4051_v61 = vadd.f32 %v3019_v55, %v1356_v51 }
 0x176   :  { %v2911_v62 = vpop.f32.mrf.mxu0  ;;  %v3021_v3 = vpop.f32.mrf.mxu1 }
 0x177   :  { %v1361_v63 = vadd.f32 %v2910_v58, %v3973_v28  ;;  %v3022_v4 = vadd.f32 %v3021_v3, %v3020_v59 }
 0x178   :  { %v2912_v5 = vpop.f32.mrf.mxu0  ;;  %v3023_v8 = vpop.f32.mrf.mxu1 }
 0x179   :  { %v2913_v7 = vadd.f32 %v2912_v5, %v2911_v62  ;;  %v4054_v9 = vadd.f32 %v3022_v4, %v1361_v63 }
 0x17a   :  { %v2914_v10 = vpop.f32.mrf.mxu0  ;;  %v3024_v15 = vpop.f32.mrf.mxu1 }
 0x17b   :  { %v1364_v14 = vadd.f32 %v2913_v7, %v3973_v28  ;;  %v3025_v16 = vadd.f32 %v3024_v15, %v3023_v8 }
 0x17c   :  { %v2915_v17 = vpop.f32.mrf.mxu0  ;;  %v3026_v20 = vpop.f32.mrf.mxu1 }
 0x17d   :  { %v2916_v19 = vadd.f32 %v2915_v17, %v2914_v10  ;;  %v4057_v22 = vadd.f32 %v3025_v16, %v1364_v14 }
 0x17e   :  { %v2917_v24 = vpop.f32.mrf.mxu0  ;;  %v3027_v27 = vpop.f32.mrf.mxu1 }
 0x17f   :  { %v1369_v26 = vadd.f32 %v2916_v19, %v3973_v28  ;;  %v3028_v30 = vadd.f32 %v3027_v27, %v3026_v20 }
 0x180   :  { %v2918_v31 = vpop.f32.mrf.mxu0  ;;  %v3029_v34 = vpop.f32.mrf.mxu1 }
 0x181   :  { %v2919_v33 = vadd.f32 %v2918_v31, %v2917_v24  ;;  %v4060_v37 = vadd.f32 %v3028_v30, %v1369_v26 }
 0x182   :  { %v2920_v38 = vpop.f32.mrf.mxu0  ;;  %v3030_v40 = vpop.f32.mrf.mxu1 }
 0x183   :  { %v1372_v39 = vadd.f32 %v2919_v33, %v3973_v28  ;;  %v3031_v44 = vadd.f32 %v3030_v40, %v3029_v34 }
 0x184   :  { %v2921_v45 = vpop.f32.mrf.mxu0  ;;  %v3032_v50 = vpop.f32.mrf.mxu1 }
 0x185   :  { %v2922_v47 = vadd.f32 %v2921_v45, %v2920_v38  ;;  %v4063_v51 = vadd.f32 %v3031_v44, %v1372_v39 }
 0x186   :  { %v2923_v52 = vpop.f32.mrf.mxu0  ;;  %v3033_v57 = vpop.f32.mrf.mxu1 }
 0x187   :  { %v1377_v55 = vadd.f32 %v2922_v47, %v3973_v28  ;;  %v3034_v58 = vadd.f32 %v3033_v57, %v3032_v50 }
 0x188   :  { %v2924_v59 = vpop.f32.mrf.mxu0  ;;  %v3035_v63 = vpop.f32.mrf.mxu1 }
 0x189   :  { %v2925_v62 = vadd.f32 %v2924_v59, %v2923_v52  ;;  %v4066_v3 = vadd.f32 %v3034_v58, %v1377_v55 }
 0x18a   :  { %v3054_v4 = vpop.f32.mrf.mxu0  ;;  %v3036_v7 = vpop.f32.mrf.mxu1 }
 0x18b   :  { %v1380_v5 = vadd.f32 %v2925_v62, %v3973_v28  ;;  %v3037_v8 = vadd.f32 %v3036_v7, %v3035_v63 }
 0x18c   :  { %v3055_v10 = vpop.f32.mrf.mxu0  ;;  %v3240_v15 = vpop.f32.mrf.mxu1 }
 0x18d   :  { %v3056_v14 = vadd.f32 %v3055_v10, %v3054_v4  ;;  %v4069_v16 = vadd.f32 %v3037_v8, %v1380_v5 }
 0x18e   :  { %v3057_v17 = vpop.f32.mrf.mxu0  ;;  %v1739_v20 = vpop.f32.mrf.mxu1 }
 0x18f   :  { %v1579_v19 = vadd.f32 %v3056_v14, %v3976_v41 }
 0x190   :  { %v3058_v24 = vpop.f32.mrf.mxu0  ;;  %v3241_v30 = vpop.f32.mrf.mxu1 }
 0x191   :  { %v3059_v26 = vadd.f32 %v3058_v24, %v3057_v17  ;;  %v1740_v27 = vadd.f32 %v1739_v20, %v1579_v19 }
 0x192   :  { %v3060_v31 = vpop.f32.mrf.mxu0  ;;  %v1742_v28 = vpop.f32.mrf.mxu1 }
 0x193   :  { %v1866_v33 = vsub.f32 0.0, %v1740_v27  ;;  %v1582_v34 = vadd.f32 %v3059_v26, %v3979_v49 }
 0x194   :  { %v3061_v38 = vpop.f32.mrf.mxu0  ;;  %v3244_v47 = vpop.f32.mrf.mxu1 }
 0x195   :  { %v1898_v39 = vmul.f32 1.442695, %v1866_v33  ;;  %v3062_v40 = vadd.f32 %v3061_v38, %v3060_v31  ;;  %v1743_v44 = vadd.f32 %v1742_v28, %v1582_v34 }
 0x196   :  { %v3063_v45 = vpop.f32.mrf.mxu0  ;;  %v1755_v62 = vpop.f32.mrf.mxu1 }
 0x197   :  { %3576 = vpow2.f32 %v1898_v39  ;;  %v1587_v50 = vadd.f32 %v3062_v40, %v3982_v60  ;;  %v1867_v41 = vsub.f32 0.0, %v1743_v44 }
 0x198   :  { %v3064_v52 = vpop.f32.mrf.mxu0  ;;  %v3245_v14 = vpop.f32.mrf.mxu1 }
 0x199   :  { %v1748_v55 = vadd.f32 %v3240_v15, %v1587_v50  ;;  %v1900_v57 = vmul.f32 1.442695, %v1867_v41  ;;  %v3065_v58 = vadd.f32 %v3064_v52, %v3063_v45 }
 0x19a   :  { %v3066_v59 = vpop.f32.mrf.mxu0  ;;  %v1758_v27 = vpop.f32.mrf.mxu1 }
 0x19b   :  { %v1868_v63 = vsub.f32 0.0, %v1748_v55  ;;  %3578 = vpow2.f32 %v1900_v57  ;;  %v1590_v49 = vadd.f32 %v3065_v58, %v3985_v6 }
 0x19c   :  { %v3067_v4 = vpop.f32.mrf.mxu0  ;;  %v3248_v44 = vpop.f32.mrf.mxu1 }
 0x19d   :  { %v1902_v5 = vmul.f32 1.442695, %v1868_v63  ;;  %v1751_v7 = vadd.f32 %v3241_v30, %v1590_v49  ;;  %v3068_v8 = vadd.f32 %v3067_v4, %v3066_v59 }
 0x19e   :  { %v3069_v10 = vpop.f32.mrf.mxu0  ;;  %v1771_v59 = vpop.f32.mrf.mxu1 }
 0x19f   :  { %3580 = vpow2.f32 %v1902_v5  ;;  %v1869_v17 = vsub.f32 0.0, %v1751_v7  ;;  %v1595_v60 = vadd.f32 %v3068_v8, %v3988_v18 }
 0x1a0   :  { %v3070_v19 = vpop.f32.mrf.mxu0 }
 0x1a1   :  { %v1904_v15 = vmul.f32 1.442695, %v1869_v17  ;;  %v3071_v20 = vadd.f32 %v3070_v19, %v3069_v10  ;;  %v1756_v24 = vadd.f32 %v1755_v62, %v1595_v60  ;;  %v3249_v17 = vpop.f32.mrf.mxu1 }
 0x1a2   :  { %v3072_v26 = vpop.f32.mrf.mxu0 }
 0x1a3   :  { %3582 = vpow2.f32 %v1904_v15  ;;  %v1870_v31 = vsub.f32 0.0, %v1756_v24  ;;  %v1598_v6 = vadd.f32 %v3071_v20, %v3991_v29 }
 0x1a4   :  { %v3577_v33 = vpop.eup %3576  ;;  %v3073_v34 = vpop.f32.mrf.mxu0 }
 0x1a5   :  { %v1962_v30 = vadd.f32 1.0, %v3577_v33  ;;  %v1906_v28 = vmul.f32 1.442695, %v1870_v31  ;;  %v3074_v38 = vadd.f32 %v3073_v34, %v3072_v26  ;;  %v1759_v39 = vadd.f32 %v1758_v27, %v1598_v6  ;;  %v1774_v31 = vpop.f32.mrf.mxu1 }
 0x1a6   :  { %v3075_v40 = vpop.f32.mrf.mxu0 }
 0x1a7   :  { %3584 = vrcp.f32 %v1962_v30  ;;  %v1603_v18 = vadd.f32 %v3074_v38, %v3994_v42  ;;  %v1871_v45 = vsub.f32 0.0, %v1759_v39 }
 0x1a8   :  { %v3579_v50 = vpop.eup %3578  ;;  %3586 = vpow2.f32 %v1906_v28  ;;  %v3076_v41 = vpop.f32.mrf.mxu0 }
 0x1a9   :  { %v1963_v52 = vadd.f32 1.0, %v3579_v50  ;;  %v1764_v55 = vadd.f32 %v3244_v47, %v1603_v18  ;;  %v1908_v57 = vmul.f32 1.442695, %v1871_v45  ;;  %v3077_v58 = vadd.f32 %v3076_v41, %v3075_v40  ;;  %v4081_v18 = vpop.f32.mrf.mxu1 }
 0x1aa   :  { %v3078_v29 = vpop.f32.mrf.mxu0 }
 0x1ab   :  { %3588 = vrcp.f32 %v1963_v52  ;;  %v1872_v62 = vsub.f32 0.0, %v1764_v55  ;;  %v1606_v63 = vadd.f32 %v3077_v58, %v3997_v53 }
 0x1ac   :  { %v3581_v49 = vpop.eup %3580  ;;  %3590 = vpow2.f32 %v1908_v57  ;;  %v3079_v4 = vpop.f32.mrf.mxu0 }
 0x1ad   :  { %v1964_v5 = vadd.f32 1.0, %v3581_v49  ;;  %v1910_v7 = vmul.f32 1.442695, %v1872_v62  ;;  %v1767_v42 = vadd.f32 %v3245_v14, %v1606_v63  ;;  %v3080_v8 = vadd.f32 %v3079_v4, %v3078_v29  ;;  %v1787_v62 = vpop.f32.mrf.mxu1 }
 0x1ae   :  { %v3081_v10 = vpop.f32.mrf.mxu0 }
 0x1af   :  { %3592 = vrcp.f32 %v1964_v5  ;;  %v1873_v60 = vsub.f32 0.0, %v1767_v42  ;;  %v1611_v47 = vadd.f32 %v3080_v8, %v4000_v2 }
 0x1b0   :  { %v3583_v19 = vpop.eup %3582  ;;  %3594 = vpow2.f32 %v1910_v7  ;;  %v3082_v15 = vpop.f32.mrf.mxu0 }
 0x1b1   :  { %v1965_v20 = vadd.f32 1.0, %v3583_v19  ;;  %v1912_v24 = vmul.f32 1.442695, %v1873_v60  ;;  %v3083_v26 = vadd.f32 %v3082_v15, %v3081_v10  ;;  %v1772_v53 = vadd.f32 %v1771_v59, %v1611_v47  ;;  %v3253_v60 = vpop.f32.mrf.mxu1 }
 0x1b2   :  { %v3084_v27 = vpop.f32.mrf.mxu0 }
 0x1b3   :  { %3596 = vrcp.f32 %v1965_v20  ;;  %v1874_v6 = vsub.f32 0.0, %v1772_v53  ;;  %v1614_v14 = vadd.f32 %v3083_v26, %v4003_v13 }
 0x1b4   :  { %v3585_v33 = vpop.eup %3584  ;;  %3598 = vpow2.f32 %v1912_v24  ;;  %v3085_v34 = vpop.f32.mrf.mxu0 }
 0x1b5   :  { %v3587_v30 = vpop.eup %3586  ;;  %v1914_v28 = vmul.f32 1.442695, %v1874_v6  ;;  %v3086_v38 = vadd.f32 %v3085_v34, %v3084_v27  ;;  %v1775_v2 = vadd.f32 %v1774_v31, %v1614_v14  ;;  %3302 = vmatprep.mubr.f32.mxu1 %v3585_v33 }
 0x1b6   :  { %v1966_v39 = vadd.f32 1.0, %v3587_v30  ;;  %v3087_v40 = vpop.f32.mrf.mxu0 }
 0x1b7   :  { %3600 = vpow2.f32 %v1914_v28  ;;  %v1619_v45 = vadd.f32 %v3086_v38, %v4006_v25  ;;  %v1875_v50 = vsub.f32 0.0, %v1775_v2 }
 0x1b8   :  { %v3589_v41 = vpop.eup %3588  ;;  %3602 = vrcp.f32 %v1966_v39  ;;  %v3088_v52 = vpop.f32.mrf.mxu0 }
 0x1b9   :  { %v3591_v13 = vpop.eup %3590  ;;  %v1780_v55 = vadd.f32 %v3248_v44, %v1619_v45  ;;  %v1916_v57 = vmul.f32 1.442695, %v1875_v50  ;;  %v3089_v58 = vadd.f32 %v3088_v52, %v3087_v40  ;;  %3303 = vmatmul.mubr.f32.vlgmr.msra.gmra.mxu1 %v3589_v41 }
 0x1ba   :  { %v1967_v29 = vadd.f32 1.0, %v3591_v13  ;;  %v3090_v59 = vpop.f32.mrf.mxu0 }
 0x1bb   :  { %v1876_v63 = vsub.f32 0.0, %v1780_v55  ;;  %3604 = vpow2.f32 %v1916_v57  ;;  %v1622_v49 = vadd.f32 %v3089_v58, %v4009_v35 }
 0x1bc   :  { %v3593_v4 = vpop.eup %3592  ;;  %3606 = vrcp.f32 %v1967_v29  ;;  %v3091_v5 = vpop.f32.mrf.mxu0 }
 0x1bd   :  { %v3595_v25 = vpop.eup %3594  ;;  %v1918_v7 = vmul.f32 1.442695, %v1876_v63  ;;  %v1783_v42 = vadd.f32 %v3249_v17, %v1622_v49  ;;  %v3092_v8 = vadd.f32 %v3091_v5, %v3090_v59  ;;  %3305 = vmatprep.mubr.f32.mxu1 %v3593_v4  ;;  %v1790_v17 = vpop.f32.mrf.mxu1 }
 0x1be   :  { %v1968_v10 = vadd.f32 1.0, %v3595_v25  ;;  %v3093_v44 = vpop.f32.mrf.mxu0 }
 0x1bf   :  { %3608 = vpow2.f32 %v1918_v7  ;;  %v1877_v47 = vsub.f32 0.0, %v1783_v42  ;;  %v1627_v19 = vadd.f32 %v3092_v8, %v4012_v46  ;;  %v4087_v40 = vpop.f32.mrf.mxu1 }
 0x1c0   :  { %v3597_v15 = vpop.eup %3596  ;;  %3610 = vrcp.f32 %v1968_v10  ;;  %v3094_v20 = vpop.f32.mrf.mxu0 }
 0x1c1   :  { %v3599_v24 = vpop.eup %3598  ;;  %v1920_v35 = vmul.f32 1.442695, %v1877_v47  ;;  %v3095_v26 = vadd.f32 %v3094_v20, %v3093_v44  ;;  %v1788_v53 = vadd.f32 %v1787_v62, %v1627_v19  ;;  %3306 = vmatmul.mubr.f32.gmra.mxu1 %v3597_v15  ;;  %v1803_v59 = vpop.f32.mrf.mxu1 }
 0x1c2   :  { %v1969_v27 = vadd.f32 1.0, %v3599_v24  ;;  %v3096_v31 = vpop.f32.mrf.mxu0 }
 0x1c3   :  { %3612 = vpow2.f32 %v1920_v35  ;;  %v1878_v6 = vsub.f32 0.0, %v1788_v53  ;;  %v1630_v14 = vadd.f32 %v3095_v26, %v4015_v56 }
 0x1c4   :  { %v3601_v33 = vpop.eup %3600  ;;  %3614 = vrcp.f32 %v1969_v27  ;;  %v3097_v34 = vpop.f32.mrf.mxu0 }
 0x1c5   :  { %v3603_v30 = vpop.eup %3602  ;;  %v1970_v46 = vadd.f32 1.0, %v3601_v33  ;;  %v1922_v28 = vmul.f32 1.442695, %v1878_v6  ;;  %v3098_v38 = vadd.f32 %v3097_v34, %v3096_v31  ;;  %v1791_v2 = vadd.f32 %v1790_v17, %v1630_v14 }
 0x1c6   :  { %3308 = vmatprep.mubr.f32.mxu1 %v3603_v30  ;;  %v3099_v39 = vpop.f32.mrf.mxu0 }
 0x1c7   :  { %3616 = vrcp.f32 %v1970_v46  ;;  %v1635_v45 = vadd.f32 %v3098_v38, %v4018_v1  ;;  %v1879_v50 = vsub.f32 0.0, %v1791_v2 }
 0x1c8   :  { %v3605_v41 = vpop.eup %3604  ;;  %3618 = vpow2.f32 %v1922_v28  ;;  %v3100_v52 = vpop.f32.mrf.mxu0 }
 0x1c9   :  { %v3607_v56 = vpop.eup %3606  ;;  %v1971_v13 = vadd.f32 1.0, %v3605_v41  ;;  %v1796_v55 = vadd.f32 %v4081_v18, %v1635_v45  ;;  %v1924_v57 = vmul.f32 1.442695, %v1879_v50  ;;  %v3101_v58 = vadd.f32 %v3100_v52, %v3099_v39  ;;  %v3257_v18 = vpop.f32.mrf.mxu1 }
 0x1ca   :  { %3309 = vmatmul.mubr.f32.gmra.mxu1 %v3607_v56  ;;  %v3102_v29 = vpop.f32.mrf.mxu0 }
 0x1cb   :  { %3620 = vrcp.f32 %v1971_v13  ;;  %v1880_v62 = vsub.f32 0.0, %v1796_v55  ;;  %v1638_v63 = vadd.f32 %v3101_v58, %v4021_v11  ;;  %v1806_v53 = vpop.f32.mrf.mxu1 }
 0x1cc   :  { %v3609_v49 = vpop.eup %3608  ;;  %3622 = vpow2.f32 %v1924_v57  ;;  %v3103_v1 = vpop.f32.mrf.mxu0 }
 0x1cd   :  { %v3611_v4 = vpop.eup %3610  ;;  %v1972_v5 = vadd.f32 1.0, %v3609_v49  ;;  %v1926_v25 = vmul.f32 1.442695, %v1880_v62  ;;  %v1799_v7 = vadd.f32 %v3253_v60, %v1638_v63  ;;  %v3104_v42 = vadd.f32 %v3103_v1, %v3102_v29  ;;  %v4094_v46 = vpop.f32.mrf.mxu1 }
 0x1ce   :  { %3311 = vmatprep.mubr.f32.mxu1 %v3611_v4  ;;  %v3105_v8 = vpop.f32.mrf.mxu0 }
 0x1cf   :  { %3624 = vrcp.f32 %v1972_v5  ;;  %v1881_v10 = vsub.f32 0.0, %v1799_v7  ;;  %v1643_v44 = vadd.f32 %v3104_v42, %v4024_v21  ;;  %v1819_v13 = vpop.f32.mrf.mxu1 }
 0x1d0   :  { %v3613_v47 = vpop.eup %3612  ;;  %3626 = vpow2.f32 %v1926_v25  ;;  %v3106_v19 = vpop.f32.mrf.mxu0 }
 0x1d1   :  { %v3615_v15 = vpop.eup %3614  ;;  %v1973_v11 = vadd.f32 1.0, %v3613_v47  ;;  %v1928_v20 = vmul.f32 1.442695, %v1881_v10  ;;  %v3107_v24 = vadd.f32 %v3106_v19, %v3105_v8  ;;  %v1804_v35 = vadd.f32 %v1803_v59, %v1643_v44  ;;  %v3261_v1 = vpop.f32.mrf.mxu1 }
 0x1d2   :  { %3312 = vmatmul.mubr.f32.gmra.mxu1 %v3615_v15  ;;  %v3108_v26 = vpop.f32.mrf.mxu0 }
 0x1d3   :  { %3628 = vrcp.f32 %v1973_v11  ;;  %v1882_v60 = vsub.f32 0.0, %v1804_v35  ;;  %v1646_v27 = vadd.f32 %v3107_v24, %v4027_v32 }
 0x1d4   :  { %v3617_v31 = vpop.eup %3616  ;;  %3630 = vpow2.f32 %v1928_v20  ;;  %v3109_v17 = vpop.f32.mrf.mxu0 }
 0x1d5   :  { %v3619_v6 = vpop.eup %3618  ;;  %v1930_v21 = vmul.f32 1.442695, %v1882_v60  ;;  %v3110_v14 = vadd.f32 %v3109_v17, %v3108_v26  ;;  %v1807_v33 = vadd.f32 %v1806_v53, %v1646_v27  ;;  %3314 = vmatprep.mubr.f32.mxu1 %v3617_v31 }
 0x1d6   :  { %v1974_v34 = vadd.f32 1.0, %v3619_v6  ;;  %v3111_v30 = vpop.f32.mrf.mxu0 }
 0x1d7   :  { %3632 = vpow2.f32 %v1930_v21  ;;  %v1651_v28 = vadd.f32 %v3110_v14, %v4030_v43  ;;  %v1883_v38 = vsub.f32 0.0, %v1807_v33 }
 0x1d8   :  { %v3621_v2 = vpop.eup %3620  ;;  %3634 = vrcp.f32 %v1974_v34  ;;  %v3112_v39 = vpop.f32.mrf.mxu0 }
 0x1d9   :  { %v3623_v32 = vpop.eup %3622  ;;  %v1812_v45 = vadd.f32 %v4087_v40, %v1651_v28  ;;  %v1932_v50 = vmul.f32 1.442695, %v1883_v38  ;;  %v3113_v41 = vadd.f32 %v3112_v39, %v3111_v30  ;;  %3315 = vmatmul.mubr.f32.gmra.mxu1 %v3621_v2 }
 0x1da   :  { %v1975_v52 = vadd.f32 1.0, %v3623_v32  ;;  %v3114_v56 = vpop.f32.mrf.mxu0 }
 0x1db   :  { %v1884_v55 = vsub.f32 0.0, %v1812_v45  ;;  %3636 = vpow2.f32 %v1932_v50  ;;  %v1654_v57 = vadd.f32 %v3113_v41, %v4033_v54 }
 0x1dc   :  { %v3625_v58 = vpop.eup %3624  ;;  %3638 = vrcp.f32 %v1975_v52  ;;  %v3115_v43 = vpop.f32.mrf.mxu0 }
 0x1dd   :  { %v3627_v29 = vpop.eup %3626  ;;  %v1934_v59 = vmul.f32 1.442695, %v1884_v55  ;;  %v1815_v62 = vadd.f32 %v3257_v18, %v1654_v57  ;;  %v3116_v63 = vadd.f32 %v3115_v43, %v3114_v56  ;;  %3317 = vmatprep.mubr.f32.mxu1 %v3625_v58  ;;  %v1822_v18 = vpop.f32.mrf.mxu1 }
 0x1de   :  { %v1976_v49 = vadd.f32 1.0, %v3627_v29  ;;  %v3117_v40 = vpop.f32.mrf.mxu0 }
 0x1df   :  { %3640 = vpow2.f32 %v1934_v59  ;;  %v1885_v4 = vsub.f32 0.0, %v1815_v62  ;;  %v1659_v5 = vadd.f32 %v3116_v63, %v4036_v0  ;;  %v4101_v27 = vpop.f32.mrf.mxu1 }
 0x1e0   :  { %v3629_v25 = vpop.eup %3628  ;;  %3642 = vrcp.f32 %v1976_v49  ;;  %v3118_v7 = vpop.f32.mrf.mxu0 }
 0x1e1   :  { %v3631_v42 = vpop.eup %3630  ;;  %v1936_v54 = vmul.f32 1.442695, %v1885_v4  ;;  %v3119_v8 = vadd.f32 %v3118_v7, %v3117_v40  ;;  %v1820_v10 = vadd.f32 %v1819_v13, %v1659_v5  ;;  %3318 = vmatmul.mubr.f32.gmra.mxu1 %v3629_v25  ;;  %v1835_v38 = vpop.f32.mrf.mxu1 }
 0x1e2   :  { %v1977_v44 = vadd.f32 1.0, %v3631_v42  ;;  %v3120_v47 = vpop.f32.mrf.mxu0 }
 0x1e3   :  { %3644 = vpow2.f32 %v1936_v54  ;;  %v1886_v19 = vsub.f32 0.0, %v1820_v10  ;;  %v1662_v15 = vadd.f32 %v3119_v8, %v4039_v12 }
 0x1e4   :  { %v3633_v11 = vpop.eup %3632  ;;  %3646 = vrcp.f32 %v1977_v44  ;;  %v3121_v20 = vpop.f32.mrf.mxu0 }
 0x1e5   :  { %v3635_v24 = vpop.eup %3634  ;;  %v1978_v0 = vadd.f32 1.0, %v3633_v11  ;;  %v1938_v35 = vmul.f32 1.442695, %v1886_v19  ;;  %v3122_v26 = vadd.f32 %v3121_v20, %v3120_v47  ;;  %v1823_v53 = vadd.f32 %v1822_v18, %v1662_v15 }
 0x1e6   :  { %3320 = vmatprep.mubr.f32.mxu1 %v3635_v24  ;;  %v3123_v60 = vpop.f32.mrf.mxu0 }
 0x1e7   :  { %3648 = vrcp.f32 %v1978_v0  ;;  %v1667_v31 = vadd.f32 %v3122_v26, %v4042_v23  ;;  %v1887_v17 = vsub.f32 0.0, %v1823_v53 }
 0x1e8   :  { %v3637_v6 = vpop.eup %3636  ;;  %3650 = vpow2.f32 %v1938_v35  ;;  %v3124_v21 = vpop.f32.mrf.mxu0 }
 0x1e9   :  { %v3639_v12 = vpop.eup %3638  ;;  %v1979_v14 = vadd.f32 1.0, %v3637_v6  ;;  %v1828_v33 = vadd.f32 %v4094_v46, %v1667_v31  ;;  %v1940_v34 = vmul.f32 1.442695, %v1887_v17  ;;  %v3125_v30 = vadd.f32 %v3124_v21, %v3123_v60  ;;  %v3265_v46 = vpop.f32.mrf.mxu1 }
 0x1ea   :  { %3321 = vmatmul.mubr.f32.gmra.mxu1 %v3639_v12  ;;  %v3126_v28 = vpop.f32.mrf.mxu0 }
 0x1eb   :  { %3652 = vrcp.f32 %v1979_v14  ;;  %v1888_v2 = vsub.f32 0.0, %v1828_v33  ;;  %v1670_v39 = vadd.f32 %v3125_v30, %v4045_v36  ;;  %v1838_v40 = vpop.f32.mrf.mxu1 }
 0x1ec   :  { %v3641_v32 = vpop.eup %3640  ;;  %3654 = vpow2.f32 %v1940_v34  ;;  %v3127_v23 = vpop.f32.mrf.mxu0 }
 0x1ed   :  { %v3643_v45 = vpop.eup %3642  ;;  %v1980_v50 = vadd.f32 1.0, %v3641_v32  ;;  %v1942_v41 = vmul.f32 1.442695, %v1888_v2  ;;  %v1831_v52 = vadd.f32 %v3261_v1, %v1670_v39  ;;  %v3128_v56 = vadd.f32 %v3127_v23, %v3126_v28  ;;  %v3268_v15 = vpop.f32.mrf.mxu1 }
 0x1ee   :  { %3323 = vmatprep.mubr.f32.mxu1 %v3643_v45  ;;  %v3129_v13 = vpop.f32.mrf.mxu0 }
 0x1ef   :  { %3656 = vrcp.f32 %v1980_v50  ;;  %v1889_v55 = vsub.f32 0.0, %v1831_v52  ;;  %v1675_v57 = vadd.f32 %v3128_v56, %v4048_v48  ;;  %v1851_v31 = vpop.f32.mrf.mxu1 }
 0x1f0   :  { %v3645_v58 = vpop.eup %3644  ;;  %3658 = vpow2.f32 %v1942_v41  ;;  %v3130_v43 = vpop.f32.mrf.mxu0 }
 0x1f1   :  { %v3647_v29 = vpop.eup %3646  ;;  %v1981_v36 = vadd.f32 1.0, %v3645_v58  ;;  %v1944_v59 = vmul.f32 1.442695, %v1889_v55  ;;  %v3131_v62 = vadd.f32 %v3130_v43, %v3129_v13  ;;  %v1836_v63 = vadd.f32 %v1835_v38, %v1675_v57  ;;  %v3269_v38 = vpop.f32.mrf.mxu1 }
 0x1f2   :  { %3324 = vmatmul.mubr.f32.gmra.mxu1 %v3647_v29  ;;  %v3132_v49 = vpop.f32.mrf.mxu0 }
 0x1f3   :  { %3660 = vrcp.f32 %v1981_v36  ;;  %v1890_v1 = vsub.f32 0.0, %v1836_v63  ;;  %v1678_v4 = vadd.f32 %v3131_v62, %v4051_v61  ;;  %v1854_v56 = vpop.f32.mrf.mxu1 }
 0x1f4   :  { %v3649_v5 = vpop.eup %3648  ;;  %3662 = vpow2.f32 %v1944_v59  ;;  %v3133_v25 = vpop.f32.mrf.mxu0 }
 0x1f5   :  { %v3651_v7 = vpop.eup %3650  ;;  %v1946_v48 = vmul.f32 1.442695, %v1890_v1  ;;  %v3134_v42 = vadd.f32 %v3133_v25, %v3132_v49  ;;  %v1839_v54 = vadd.f32 %v1838_v40, %v1678_v4  ;;  %3326 = vmatprep.mubr.f32.mxu1 %v3649_v5 }
 0x1f6   :  { %v1982_v8 = vadd.f32 1.0, %v3651_v7  ;;  %v3135_v10 = vpop.f32.mrf.mxu0 }
 0x1f7   :  { %3664 = vpow2.f32 %v1946_v48  ;;  %v1683_v44 = vadd.f32 %v3134_v42, %v4054_v9  ;;  %v1891_v47 = vsub.f32 0.0, %v1839_v54 }
 0x1f8   :  { %v3653_v18 = vpop.eup %3652  ;;  %3666 = vrcp.f32 %v1982_v8  ;;  %v3136_v19 = vpop.f32.mrf.mxu0 }
 0x1f9   :  { %v3655_v11 = vpop.eup %3654  ;;  %v1844_v61 = vadd.f32 %v4101_v27, %v1683_v44  ;;  %v1948_v20 = vmul.f32 1.442695, %v1891_v47  ;;  %v3137_v24 = vadd.f32 %v3136_v19, %v3135_v10  ;;  %3327 = vmatmul.mubr.f32.gmra.mxu1 %v3653_v18 }
 0x1fa   :  { %v1983_v0 = vadd.f32 1.0, %v3655_v11  ;;  %v3138_v35 = vpop.f32.mrf.mxu0 }
 0x1fb   :  { %v1892_v26 = vsub.f32 0.0, %v1844_v61  ;;  %3668 = vpow2.f32 %v1948_v20  ;;  %v1686_v53 = vadd.f32 %v3137_v24, %v4057_v22 }
 0x1fc   :  { %v3657_v60 = vpop.eup %3656  ;;  %3670 = vrcp.f32 %v1983_v0  ;;  %v3139_v9 = vpop.f32.mrf.mxu0 }
 0x1fd   :  { %v3659_v17 = vpop.eup %3658  ;;  %v1950_v6 = vmul.f32 1.442695, %v1892_v26  ;;  %v1847_v21 = vadd.f32 %v3265_v46, %v1686_v53  ;;  %v3140_v12 = vadd.f32 %v3139_v9, %v3138_v35  ;;  %3329 = vmatprep.mubr.f32.mxu1 %v3657_v60 }
 0x1fe   :  { %v1984_v14 = vadd.f32 1.0, %v3659_v17  ;;  %v3141_v27 = vpop.f32.mrf.mxu0 }
 0x1ff   :  { %3672 = vpow2.f32 %v1950_v6  ;;  %v1893_v33 = vsub.f32 0.0, %v1847_v21  ;;  %v1691_v34 = vadd.f32 %v3140_v12, %v4060_v37  ;;  %v4118_v6 = vld [vmem:[%s4418_s4] ss:$0 sm:$0xff]  ;;  %s3927_s4 = smov [#allocation8]  }
 0x200   :  { %v3661_v30 = vpop.eup %3660  ;;  %3674 = vrcp.f32 %v1984_v14  ;;  %v3142_v28 = vpop.f32.mrf.mxu0  ;;  %s2631_s14 = sshll.u32 %s3927_s4, 4  ;;  %s2632_s14 = int_to_ptr.vmem [resolvable:$true] %s2631_s14 }
 0x201   :  { %v3663_v22 = vpop.eup %3662  ;;  %v1952_v2 = vmul.f32 1.442695, %v1893_v33  ;;  %v1852_v39 = vadd.f32 %v1851_v31, %v1691_v34  ;;  %v3143_v32 = vadd.f32 %v3142_v28, %v3141_v27  ;;  %3330 = vmatmul.mubr.f32.gmra.mxu1 %v3661_v30  ;;  %s3892_s15 = scalar_lea.vmem %s2632_s14, 4096  ;;  %p3897_p2 = scmp.lt.s32.totalorder %s2632_s14, %s2632_s14 }
 0x202   :  { %v1985_v23 = vadd.f32 1.0, %v3663_v22  ;;  %v3144_v45 = vpop.f32.mrf.mxu0  ;;  %p3893_p1 = scmp.ne.s32.totalorder %s2632_s14, %s3892_s15  ;;  %p3898_p3 = scmp.lt.s32.totalorder %s3892_s15, %s3892_s15 }
 0x203   :  { %3676 = vpow2.f32 %v1952_v2  ;;  %v1894_v50 = vsub.f32 0.0, %v1852_v39  ;;  %v1694_v41 = vadd.f32 %v3143_v32, %v4063_v51 }
 0x204   :  { %v3665_v52 = vpop.eup %3664  ;;  %3678 = vrcp.f32 %v1985_v23  ;;  %v3145_v13 = vpop.f32.mrf.mxu0  ;;  %p3899_p4 = por %p3898_p3, %p3897_p2 }
 0x205   :  { %v3667_v37 = vpop.eup %3666  ;;  %v1986_v46 = vadd.f32 1.0, %v3665_v52  ;;  %v1954_v55 = vmul.f32 1.442695, %v1894_v50  ;;  %v1855_v57 = vadd.f32 %v1854_v56, %v1694_v41  ;;  %v3146_v58 = vadd.f32 %v3145_v13, %v3144_v45 }
 0x206   :  { %3332 = vmatprep.mubr.f32.mxu1 %v3667_v37  ;;  %v3147_v43 = vpop.f32.mrf.mxu0  ;;  %p3900_p5 = pnand %p3899_p4, %p3893_p1 }
 0x207   :  { %3680 = vrcp.f32 %v1986_v46  ;;  %v1895_v29 = vsub.f32 0.0, %v1855_v57  ;;  %v1699_v36 = vadd.f32 %v3146_v58, %v4066_v3 }
 0x208   :  { %v3669_v59 = vpop.eup %3668  ;;  %3682 = vpow2.f32 %v1954_v55  ;;  %v3148_v62 = vpop.f32.mrf.mxu0 }
 0x209   :  { %v3671_v63 = vpop.eup %3670  ;;  %v1987_v51 = vadd.f32 1.0, %v3669_v59  ;;  %v1956_v49 = vmul.f32 1.442695, %v1895_v29  ;;  %v1860_v40 = vadd.f32 %v3268_v15, %v1699_v36  ;;  %v3149_v1 = vadd.f32 %v3148_v62, %v3147_v43 }
 0x20a   :  { %3333 = vmatmul.mubr.f32.gmra.mxu1 %v3671_v63 }
 0x20b   :  { %3684 = vrcp.f32 %v1987_v51  ;;  %v1896_v4 = vsub.f32 0.0, %v1860_v40  ;;  %v1702_v5 = vadd.f32 %v3149_v1, %v4069_v16 }
 0x20c   :  { %v3673_v25 = vpop.eup %3672  ;;  %3686 = vpow2.f32 %v1956_v49 }
 0x20d   :  { %v3675_v7 = vpop.eup %3674  ;;  %v1988_v48 = vadd.f32 1.0, %v3673_v25  ;;  %v1958_v42 = vmul.f32 1.442695, %v1896_v4  ;;  %v1863_v54 = vadd.f32 %v3269_v38, %v1702_v5 }
 0x20e   :  { %3335 = vmatprep.mubr.f32.mxu1 %v3675_v7 }
 0x20f   :  { %3688 = vrcp.f32 %v1988_v48  ;;  %v1897_v3 = vsub.f32 0.0, %v1863_v54 }
 0x210   :  { %v3677_v8 = vpop.eup %3676  ;;  %3690 = vpow2.f32 %v1958_v42 }
 0x211   :  { %v3679_v10 = vpop.eup %3678  ;;  %v1989_v44 = vadd.f32 1.0, %v3677_v8  ;;  %v1960_v47 = vmul.f32 1.442695, %v1897_v3 }
 0x212   :  { %3336 = vmatmul.mubr.f32.gmra.mxu1 %v3679_v10 }
 0x213   :  { %3692 = vrcp.f32 %v1989_v44 }
 0x214   :  { %v3681_v18 = vpop.eup %3680  ;;  %3694 = vpow2.f32 %v1960_v47 }
 0x215   :  { %v3683_v19 = vpop.eup %3682  ;;  %3338 = vmatprep.mubr.f32.mxu1 %v3681_v18 }
 0x216   :  { %v1990_v16 = vadd.f32 1.0, %v3683_v19 }
 0x218   :  { %v3685_v15 = vpop.eup %3684  ;;  %3696 = vrcp.f32 %v1990_v16 }
 0x219   :  { %v3687_v11 = vpop.eup %3686  ;;  %3339 = vmatmul.mubr.f32.gmra.mxu1 %v3685_v15 }
 0x21a   :  { %v1991_v61 = vadd.f32 1.0, %v3687_v11 }
 0x21c   :  { %v3689_v20 = vpop.eup %3688  ;;  %3698 = vrcp.f32 %v1991_v61 }
 0x21d   :  { %v3691_v24 = vpop.eup %3690  ;;  %3341 = vmatprep.mubr.f32.mxu1 %v3689_v20 }
 0x21e   :  { %v1992_v0 = vadd.f32 1.0, %v3691_v24 }
 0x220   :  { %v3693_v35 = vpop.eup %3692  ;;  %3700 = vrcp.f32 %v1992_v0 }
 0x221   :  { %v3695_v26 = vpop.eup %3694  ;;  %3342 = vmatmul.mubr.f32.gmra.mxu1 %v3693_v35 }
 0x222   :  { %v1993_v53 = vadd.f32 1.0, %v3695_v26 }
 0x224   :  { %3702 = vrcp.f32 %v1993_v53 }
 0x225   :  { %v3697_v60 = vpop.eup %3696 }
 0x226   :  { %3344 = vmatprep.mubr.f32.mxu1 %v3697_v60 }
 0x229   :  { %v3699_v9 = vpop.eup %3698 }
 0x22a   :  { %3345 = vmatmul.mubr.f32.gmra.mxu1 %v3699_v9 }
 0x22d   :  { %v3701_v31 = vpop.eup %3700 }
 0x22e   :  { %3347 = vmatprep.mubr.f32.mxu1 %v3701_v31 }
 0x231   :  { %v3703_v17 = vpop.eup %3702 }
 0x232   :  { %3348 = vmatmul.mubr.f32.gmra.mxu1 %v3703_v17 }
 0x279   :  { %v3304_v21 = vpop.f32.mrf.mxu1 }
 0x27a   :  { %v4121_v12 = vadd.f32 %v3304_v21, %v4118_v6 }
 0x27b   :  { %v2115_v14 = vpop.f32.mrf.mxu1 }
 0x27c   :  { %2276 = vmax.xlane.f32.xlu0 %v4121_v12  ;;  %v4125_v27 = vadd.f32 %v4118_v6, %v2115_v14 }
 0x280   :  { %2274 = vmax.xlane.f32.xlu0 %v4125_v27 }
 0x281   :  { %v3307_v33 = vpop.f32.mrf.mxu1 }
 0x282   :  { %v4129_v34 = vadd.f32 %v3307_v33, %v4118_v6 }
 0x283   :  { %v2125_v30 = vpop.f32.mrf.mxu1 }
 0x284   :  { %2280 = vmax.xlane.f32.xlu1 %v4129_v34  ;;  %v4133_v28 = vadd.f32 %v4118_v6, %v2125_v30 }
 0x288   :  { %2278 = vmax.xlane.f32.xlu1 %v4133_v28 }
 0x28a   :  { %v3310_v38 = vpop.f32.mrf.mxu1 }
 0x28b   :  { %v4137_v22 = vadd.f32 %v3310_v38, %v4118_v6 }
 0x28c   :  { %v2135_v2 = vpop.f32.mrf.mxu1 }
 0x28d   :  { %v4140_v39 = vadd.f32 %v4118_v6, %v2135_v2  ;;  %2284 = vmax.xlane.f32.xlu1 %v4137_v22 }
 0x28f   :  { %2282 = vmax.xlane.f32.xlu0 %v4140_v39 }
 0x292   :  { %v3313_v32 = vpop.f32.mrf.mxu1 }
 0x293   :  { %v4145_v23 = vadd.f32 %v3313_v32, %v4118_v6 }
 0x294   :  { %v2145_v45 = vpop.f32.mrf.mxu1 }
 0x295   :  { %v4148_v50 = vadd.f32 %v4118_v6, %v2145_v45  ;;  %2288 = vmax.xlane.f32.xlu1 %v4145_v23 }
 0x297   :  { %2286 = vmax.xlane.f32.xlu0 %v4148_v50 }
 0x299   :  { %v3316_v41 = vpop.f32.mrf.mxu1 }
 0x29a   :  { %v4153_v52 = vadd.f32 %v3316_v41, %v4118_v6 }
 0x29b   :  { %v2155_v56 = vpop.f32.mrf.mxu1 }
 0x29c   :  { %v4156_v13 = vadd.f32 %v4118_v6, %v2155_v56  ;;  %2292 = vmax.xlane.f32.xlu1 %v4153_v52 }
 0x29e   :  { %2290 = vmax.xlane.f32.xlu0 %v4156_v13 }
 0x2a1   :  { %v3319_v37 = vpop.f32.mrf.mxu1 }
 0x2a2   :  { %v4161_v46 = vadd.f32 %v3319_v37, %v4118_v6 }
 0x2a3   :  { %v2165_v55 = vpop.f32.mrf.mxu1 }
 0x2a4   :  { %v4164_v57 = vadd.f32 %v4118_v6, %v2165_v55  ;;  %2296 = vmax.xlane.f32.xlu1 %v4161_v46 }
 0x2a6   :  { %2294 = vmax.xlane.f32.xlu0 %v4164_v57 }
 0x2aa   :  { %v3322_v58 = vpop.f32.mrf.mxu1 }
 0x2ab   :  { %v4169_v43 = vadd.f32 %v3322_v58, %v4118_v6 }
 0x2ac   :  { %v2175_v29 = vpop.f32.mrf.mxu1 }
 0x2ad   :  { %v4172_v36 = vadd.f32 %v4118_v6, %v2175_v29  ;;  %2300 = vmax.xlane.f32.xlu1 %v4169_v43 }
 0x2af   :  { %2298 = vmax.xlane.f32.xlu0 %v4172_v36 }
 0x2b2   :  { %v3325_v59 = vpop.f32.mrf.mxu1 }
 0x2b3   :  { %v4177_v62 = vadd.f32 %v3325_v59, %v4118_v6 }
 0x2b4   :  { %v2185_v63 = vpop.f32.mrf.mxu1 }
 0x2b5   :  { %v4180_v51 = vadd.f32 %v4118_v6, %v2185_v63  ;;  %2304 = vmax.xlane.f32.xlu1 %v4177_v62 }
 0x2b7   :  { %2302 = vmax.xlane.f32.xlu0 %v4180_v51 }
 0x2b9   :  { %v3328_v49 = vpop.f32.mrf.mxu1 }
 0x2ba   :  { %v4185_v40 = vadd.f32 %v3328_v49, %v4118_v6 }
 0x2bb   :  { %v2195_v1 = vpop.f32.mrf.mxu1 }
 0x2bc   :  { %v4188_v4 = vadd.f32 %v4118_v6, %v2195_v1  ;;  %2308 = vmax.xlane.f32.xlu1 %v4185_v40 }
 0x2be   :  { %2306 = vmax.xlane.f32.xlu0 %v4188_v4 }
 0x2c1   :  { %v3331_v5 = vpop.f32.mrf.mxu1 }
 0x2c2   :  { %v4193_v25 = vadd.f32 %v3331_v5, %v4118_v6 }
 0x2c3   :  { %v2205_v7 = vpop.f32.mrf.mxu1 }
 0x2c4   :  { %v4196_v48 = vadd.f32 %v4118_v6, %v2205_v7  ;;  %2312 = vmax.xlane.f32.xlu1 %v4193_v25 }
 0x2c6   :  { %2310 = vmax.xlane.f32.xlu0 %v4196_v48 }
 0x2ca   :  { %v3334_v42 = vpop.f32.mrf.mxu1 }
 0x2cb   :  { %v4201_v54 = vadd.f32 %v3334_v42, %v4118_v6 }
 0x2cc   :  { %v2215_v3 = vpop.f32.mrf.mxu1 }
 0x2cd   :  { %v4204_v8 = vadd.f32 %v4118_v6, %v2215_v3  ;;  %2316 = vmax.xlane.f32.xlu1 %v4201_v54 }
 0x2cf   :  { %2314 = vmax.xlane.f32.xlu0 %v4204_v8 }
 0x2d2   :  { %v3337_v10 = vpop.f32.mrf.mxu1 }
 0x2d3   :  { %v4209_v44 = vadd.f32 %v3337_v10, %v4118_v6 }
 0x2d4   :  { %v2225_v47 = vpop.f32.mrf.mxu1 }
 0x2d5   :  { %v4212_v18 = vadd.f32 %v4118_v6, %v2225_v47  ;;  %2320 = vmax.xlane.f32.xlu1 %v4209_v44 }
 0x2d7   :  { %2318 = vmax.xlane.f32.xlu0 %v4212_v18 }
 0x2d9   :  { %v3340_v19 = vpop.f32.mrf.mxu1 }
 0x2da   :  { %v4217_v16 = vadd.f32 %v3340_v19, %v4118_v6 }
 0x2db   :  { %v2235_v15 = vpop.f32.mrf.mxu1 }
 0x2dc   :  { %v4220_v11 = vadd.f32 %v4118_v6, %v2235_v15  ;;  %2324 = vmax.xlane.f32.xlu1 %v4217_v16 }
 0x2de   :  { %2322 = vmax.xlane.f32.xlu0 %v4220_v11 }
 0x2e1   :  { %v3343_v61 = vpop.f32.mrf.mxu1 }
 0x2e2   :  { %v4225_v20 = vadd.f32 %v3343_v61, %v4118_v6 }
 0x2e3   :  { %v2245_v24 = vpop.f32.mrf.mxu1 }
 0x2e4   :  { %v4228_v0 = vadd.f32 %v4118_v6, %v2245_v24  ;;  %2328 = vmax.xlane.f32.xlu1 %v4225_v20 }
 0x2e6   :  { %2326 = vmax.xlane.f32.xlu0 %v4228_v0 }
 0x2ea   :  { %v3346_v35 = vpop.f32.mrf.mxu1 }
 0x2eb   :  { %v4233_v26 = vadd.f32 %v3346_v35, %v4118_v6 }
 0x2ec   :  { %v2255_v53 = vpop.f32.mrf.mxu1 }
 0x2ed   :  { %v4236_v60 = vadd.f32 %v4118_v6, %v2255_v53  ;;  %2332 = vmax.xlane.f32.xlu1 %v4233_v26 }
 0x2ef   :  { %2330 = vmax.xlane.f32.xlu0 %v4236_v60 }
 0x2f2   :  { %v3349_v9 = vpop.f32.mrf.mxu1 }
 0x2f3   :  { %v4241_v31 = vadd.f32 %v3349_v9, %v4118_v6 }
 0x2f4   :  { %v2265_v17 = vpop.f32.mrf.mxu1 }
 0x2f5   :  { %v4244_v21 = vadd.f32 %v4118_v6, %v2265_v17  ;;  %2336 = vmax.xlane.f32.xlu1 %v4241_v31 }
 0x2f7   :  { %2334 = vmax.xlane.f32.xlu0 %v4244_v21 }
 0x305   :  { %v2277_v14 = vpop.xlane.xlu0 %2276 }
 0x306   :  { %v4249_v33 = vsub.f32 %v4121_v12, %v2277_v14 }
 0x308   :  { %v2372_v30 = vmul.f32 1.442695, %v4249_v33 }
 0x309   :  { %v2275_v38 = vpop.xlane.xlu0 %2274 }
 0x30a   :  { %3704 = vpow2.f32 %v2372_v30  ;;  %v4253_v2 = vsub.f32 %v4125_v27, %v2275_v38 }
 0x30c   :  { %v2370_v32 = vmul.f32 1.442695, %v4253_v2 }
 0x30d   :  { %v2281_v45 = vpop.xlane.xlu1 %2280 }
 0x30e   :  { %3706 = vpow2.f32 %v2370_v32  ;;  %v4257_v6 = vsub.f32 %v4129_v34, %v2281_v45 }
 0x310   :  { %v2376_v41 = vmul.f32 1.442695, %v4257_v6 }
 0x311   :  { %v2279_v56 = vpop.xlane.xlu1 %2278 }
 0x312   :  { %3708 = vpow2.f32 %v2376_v41  ;;  %v4261_v12 = vsub.f32 %v4133_v28, %v2279_v56 }
 0x314   :  { %v2374_v37 = vmul.f32 1.442695, %v4261_v12 }
 0x316   :  { %3710 = vpow2.f32 %v2374_v37  ;;  %v2285_v55 = vpop.xlane.xlu1 %2284 }
 0x317   :  { %v3705_v27 = vpop.eup %3704  ;;  %v4265_v58 = vsub.f32 %v4137_v22, %v2285_v55 }
 0x318   :  { %v2283_v29 = vpop.xlane.xlu0 %2282  ;;  %2436 = vadd.xlane.f32.xlu1 %v3705_v27 }
 0x319   :  { %v2380_v34 = vmul.f32 1.442695, %v4265_v58  ;;  %v4269_v59 = vsub.f32 %v4140_v39, %v2283_v29 }
 0x31b   :  { %v3707_v63 = vpop.eup %3706  ;;  %3712 = vpow2.f32 %v2380_v34  ;;  %v2378_v28 = vmul.f32 1.442695, %v4269_v59 }
 0x31c   :  { %2434 = vadd.xlane.f32.xlu0 %v3707_v63 }
 0x31d   :  { %3714 = vpow2.f32 %v2378_v28 }
 0x31e   :  { %v2289_v49 = vpop.xlane.xlu1 %2288 }
 0x31f   :  { %v3709_v1 = vpop.eup %3708  ;;  %v4273_v5 = vsub.f32 %v4145_v23, %v2289_v49 }
 0x320   :  { %v2287_v22 = vpop.xlane.xlu0 %2286  ;;  %2440 = vadd.xlane.f32.xlu1 %v3709_v1 }
 0x321   :  { %v2384_v7 = vmul.f32 1.442695, %v4273_v5  ;;  %v4277_v42 = vsub.f32 %v4148_v50, %v2287_v22 }
 0x323   :  { %v3711_v39 = vpop.eup %3710  ;;  %3716 = vpow2.f32 %v2384_v7  ;;  %v2382_v3 = vmul.f32 1.442695, %v4277_v42 }
 0x324   :  { %2438 = vadd.xlane.f32.xlu0 %v3711_v39 }
 0x325   :  { %3718 = vpow2.f32 %v2382_v3  ;;  %v2293_v10 = vpop.xlane.xlu1 %2292 }
 0x326   :  { %v4281_v47 = vsub.f32 %v4153_v52, %v2293_v10 }
 0x327   :  { %v2291_v19 = vpop.xlane.xlu0 %2290 }
 0x328   :  { %v3713_v23 = vpop.eup %3712  ;;  %v2388_v15 = vmul.f32 1.442695, %v4281_v47  ;;  %v4285_v61 = vsub.f32 %v4156_v13, %v2291_v19 }
 0x329   :  { %2444 = vadd.xlane.f32.xlu1 %v3713_v23 }
 0x32a   :  { %v3715_v50 = vpop.eup %3714  ;;  %3720 = vpow2.f32 %v2388_v15  ;;  %v2386_v24 = vmul.f32 1.442695, %v4285_v61 }
 0x32b   :  { %2442 = vadd.xlane.f32.xlu0 %v3715_v50 }
 0x32c   :  { %3722 = vpow2.f32 %v2386_v24 }
 0x32d   :  { %v2297_v35 = vpop.xlane.xlu1 %2296 }
 0x32e   :  { %v4289_v53 = vsub.f32 %v4161_v46, %v2297_v35 }
 0x32f   :  { %v2295_v52 = vpop.xlane.xlu0 %2294 }
 0x330   :  { %v3717_v9 = vpop.eup %3716  ;;  %v2392_v17 = vmul.f32 1.442695, %v4289_v53  ;;  %v4293_v14 = vsub.f32 %v4164_v57, %v2295_v52 }
 0x331   :  { %2448 = vadd.xlane.f32.xlu1 %v3717_v9 }
 0x332   :  { %v3719_v13 = vpop.eup %3718  ;;  %3724 = vpow2.f32 %v2392_v17  ;;  %v2390_v30 = vmul.f32 1.442695, %v4293_v14 }
 0x333   :  { %2446 = vadd.xlane.f32.xlu0 %v3719_v13 }
 0x334   :  { %3726 = vpow2.f32 %v2390_v30 }
 0x336   :  { %v2301_v38 = vpop.xlane.xlu1 %2300 }
 0x337   :  { %v3721_v32 = vpop.eup %3720  ;;  %v4297_v45 = vsub.f32 %v4169_v43, %v2301_v38 }
 0x338   :  { %v2299_v46 = vpop.xlane.xlu0 %2298  ;;  %2452 = vadd.xlane.f32.xlu1 %v3721_v32 }
 0x339   :  { %v3723_v41 = vpop.eup %3722  ;;  %v2396_v56 = vmul.f32 1.442695, %v4297_v45  ;;  %v4301_v57 = vsub.f32 %v4172_v36, %v2299_v46 }
 0x33a   :  { %2450 = vadd.xlane.f32.xlu0 %v3723_v41 }
 0x33b   :  { %3728 = vpow2.f32 %v2396_v56  ;;  %v2394_v37 = vmul.f32 1.442695, %v4301_v57 }
 0x33d   :  { %3730 = vpow2.f32 %v2394_v37 }
 0x33e   :  { %v2305_v55 = vpop.xlane.xlu1 %2304 }
 0x33f   :  { %v3725_v27 = vpop.eup %3724  ;;  %v4305_v29 = vsub.f32 %v4177_v62, %v2305_v55 }
 0x340   :  { %v2303_v43 = vpop.xlane.xlu0 %2302  ;;  %2456 = vadd.xlane.f32.xlu1 %v3725_v27 }
 0x341   :  { %v3727_v34 = vpop.eup %3726  ;;  %v2400_v63 = vmul.f32 1.442695, %v4305_v29  ;;  %v4309_v28 = vsub.f32 %v4180_v51, %v2303_v43 }
 0x342   :  { %2454 = vadd.xlane.f32.xlu0 %v3727_v34 }
 0x343   :  { %3732 = vpow2.f32 %v2400_v63  ;;  %v2398_v36 = vmul.f32 1.442695, %v4309_v28 }
 0x345   :  { %3734 = vpow2.f32 %v2398_v36  ;;  %v2309_v49 = vpop.xlane.xlu1 %2308 }
 0x346   :  { %v4313_v1 = vsub.f32 %v4185_v40, %v2309_v49 }
 0x347   :  { %v2307_v22 = vpop.xlane.xlu0 %2306 }
 0x348   :  { %v3729_v62 = vpop.eup %3728  ;;  %v2404_v7 = vmul.f32 1.442695, %v4313_v1  ;;  %v4317_v39 = vsub.f32 %v4188_v4, %v2307_v22 }
 0x349   :  { %2460 = vadd.xlane.f32.xlu1 %v3729_v62 }
 0x34a   :  { %v3731_v3 = vpop.eup %3730  ;;  %3736 = vpow2.f32 %v2404_v7  ;;  %v2402_v51 = vmul.f32 1.442695, %v4317_v39 }
 0x34b   :  { %2458 = vadd.xlane.f32.xlu0 %v3731_v3 }
 0x34c   :  { %3738 = vpow2.f32 %v2402_v51 }
 0x34d   :  { %v2313_v10 = vpop.xlane.xlu1 %2312 }
 0x34e   :  { %v4321_v19 = vsub.f32 %v4193_v25, %v2313_v10 }
 0x34f   :  { %v2311_v40 = vpop.xlane.xlu0 %2310 }
 0x350   :  { %v3733_v23 = vpop.eup %3732  ;;  %v2408_v15 = vmul.f32 1.442695, %v4321_v19  ;;  %v4325_v50 = vsub.f32 %v4196_v48, %v2311_v40 }
 0x351   :  { %2464 = vadd.xlane.f32.xlu1 %v3733_v23 }
 0x352   :  { %v3735_v4 = vpop.eup %3734  ;;  %3740 = vpow2.f32 %v2408_v15  ;;  %v2406_v24 = vmul.f32 1.442695, %v4325_v50 }
 0x353   :  { %2462 = vadd.xlane.f32.xlu0 %v3735_v4 }
 0x354   :  { %3742 = vpow2.f32 %v2406_v24 }
 0x356   :  { %v2317_v35 = vpop.xlane.xlu1 %2316 }
 0x357   :  { %v3737_v52 = vpop.eup %3736  ;;  %v4329_v9 = vsub.f32 %v4201_v54, %v2317_v35 }
 0x358   :  { %v2315_v25 = vpop.xlane.xlu0 %2314  ;;  %2468 = vadd.xlane.f32.xlu1 %v3737_v52 }
 0x359   :  { %v3739_v17 = vpop.eup %3738  ;;  %v2412_v13 = vmul.f32 1.442695, %v4329_v9  ;;  %v4333_v48 = vsub.f32 %v4204_v8, %v2315_v25 }
 0x35a   :  { %2466 = vadd.xlane.f32.xlu0 %v3739_v17 }
 0x35b   :  { %3744 = vpow2.f32 %v2412_v13  ;;  %v2410_v30 = vmul.f32 1.442695, %v4333_v48 }
 0x35d   :  { %3746 = vpow2.f32 %v2410_v30 }
 0x35e   :  { %v2321_v38 = vpop.xlane.xlu1 %2320 }
 0x35f   :  { %v3741_v32 = vpop.eup %3740  ;;  %v4337_v46 = vsub.f32 %v4209_v44, %v2321_v38 }
 0x360   :  { %v2319_v54 = vpop.xlane.xlu0 %2318  ;;  %2472 = vadd.xlane.f32.xlu1 %v3741_v32 }
 0x361   :  { %v3743_v41 = vpop.eup %3742  ;;  %v2416_v56 = vmul.f32 1.442695, %v4337_v46  ;;  %v4341_v37 = vsub.f32 %v4212_v18, %v2319_v54 }
 0x362   :  { %2470 = vadd.xlane.f32.xlu0 %v3743_v41 }
 0x363   :  { %3748 = vpow2.f32 %v2416_v56  ;;  %v2414_v8 = vmul.f32 1.442695, %v4341_v37 }
 0x365   :  { %3750 = vpow2.f32 %v2414_v8  ;;  %v2325_v55 = vpop.xlane.xlu1 %2324 }
 0x366   :  { %v4345_v27 = vsub.f32 %v4217_v16, %v2325_v55 }
 0x367   :  { %v2323_v43 = vpop.xlane.xlu0 %2322 }
 0x368   :  { %v3745_v44 = vpop.eup %3744  ;;  %v2420_v34 = vmul.f32 1.442695, %v4345_v27  ;;  %v4349_v63 = vsub.f32 %v4220_v11, %v2323_v43 }
 0x369   :  { %2476 = vadd.xlane.f32.xlu1 %v3745_v44 }
 0x36a   :  { %v3747_v36 = vpop.eup %3746  ;;  %3752 = vpow2.f32 %v2420_v34  ;;  %v2418_v18 = vmul.f32 1.442695, %v4349_v63 }
 0x36b   :  { %2474 = vadd.xlane.f32.xlu0 %v3747_v36 }
 0x36c   :  { %3754 = vpow2.f32 %v2418_v18 }
 0x36d   :  { %v2329_v49 = vpop.xlane.xlu1 %2328 }
 0x36e   :  { %v4353_v22 = vsub.f32 %v4225_v20, %v2329_v49 }
 0x36f   :  { %v2327_v16 = vpop.xlane.xlu0 %2326 }
 0x370   :  { %v3749_v62 = vpop.eup %3748  ;;  %v2424_v7 = vmul.f32 1.442695, %v4353_v22  ;;  %v4357_v3 = vsub.f32 %v4228_v0, %v2327_v16 }
 0x371   :  { %2480 = vadd.xlane.f32.xlu1 %v3749_v62 }
 0x372   :  { %v3751_v11 = vpop.eup %3750  ;;  %3756 = vpow2.f32 %v2424_v7  ;;  %v2422_v51 = vmul.f32 1.442695, %v4357_v3 }
 0x373   :  { %2478 = vadd.xlane.f32.xlu0 %v3751_v11 }
 0x374   :  { %3758 = vpow2.f32 %v2422_v51 }
 0x376   :  { %v2333_v10 = vpop.xlane.xlu1 %2332 }
 0x377   :  { %v3753_v40 = vpop.eup %3752  ;;  %v4361_v23 = vsub.f32 %v4233_v26, %v2333_v10 }
 0x378   :  { %v2331_v20 = vpop.xlane.xlu0 %2330  ;;  %2484 = vadd.xlane.f32.xlu1 %v3753_v40 }
 0x379   :  { %v3755_v15 = vpop.eup %3754  ;;  %v2428_v4 = vmul.f32 1.442695, %v4361_v23  ;;  %v4365_v0 = vsub.f32 %v4236_v60, %v2331_v20 }
 0x37a   :  { %2482 = vadd.xlane.f32.xlu0 %v3755_v15 }
 0x37b   :  { %3760 = vpow2.f32 %v2428_v4  ;;  %v2426_v24 = vmul.f32 1.442695, %v4365_v0 }
 0x37d   :  { %3762 = vpow2.f32 %v2426_v24 }
 0x37e   :  { %v2337_v35 = vpop.xlane.xlu1 %2336 }
 0x37f   :  { %v3757_v52 = vpop.eup %3756  ;;  %v4369_v25 = vsub.f32 %v4241_v31, %v2337_v35 }
 0x380   :  { %v2335_v26 = vpop.xlane.xlu0 %2334  ;;  %2488 = vadd.xlane.f32.xlu1 %v3757_v52 }
 0x381   :  { %v3759_v17 = vpop.eup %3758  ;;  %v2432_v13 = vmul.f32 1.442695, %v4369_v25  ;;  %v4373_v30 = vsub.f32 %v4244_v21, %v2335_v26 }
 0x382   :  { %2486 = vadd.xlane.f32.xlu0 %v3759_v17 }
 0x383   :  { %3764 = vpow2.f32 %v2432_v13  ;;  %v2430_v60 = vmul.f32 1.442695, %v4373_v30 }
 0x385   :  { %3766 = vpow2.f32 %v2430_v60 }
 0x388   :  { %v3761_v38 = vpop.eup %3760 }
 0x389   :  { %2492 = vadd.xlane.f32.xlu1 %v3761_v38 }
 0x38a   :  { %v3763_v32 = vpop.eup %3762 }
 0x38b   :  { %2490 = vadd.xlane.f32.xlu0 %v3763_v32 }
 0x390   :  { %v3765_v54 = vpop.eup %3764 }
 0x391   :  { %2496 = vadd.xlane.f32.xlu1 %v3765_v54 }
 0x392   :  { %v3767_v31 = vpop.eup %3766 }
 0x393   :  { %2494 = vadd.xlane.f32.xlu0 %v3767_v31 }
 0x3a1   :  { %v2437_v41 = vpop.xlane.xlu1 %2436 }
 0x3a2   :  { %3768 = vlog2.f32 %v2437_v41 }
 0x3a5   :  { %v2435_v56 = vpop.xlane.xlu0 %2434 }
 0x3a6   :  { %3770 = vlog2.f32 %v2435_v56 }
 0x3a9   :  { %v2441_v8 = vpop.xlane.xlu1 %2440 }
 0x3aa   :  { %3772 = vlog2.f32 %v2441_v8 }
 0x3ad   :  { %v2439_v21 = vpop.xlane.xlu0 %2438 }
 0x3ae   :  { %3774 = vlog2.f32 %v2439_v21 }
 0x3af   :  { %v3769_v55 = vpop.eup %3768 }
 0x3b0   :  { %v2501_v43 = vmul.f32 0.6931472, %v3769_v55 }
 0x3b2   :  { %v2563_v44 = vsub.f32 %v4249_v33, %v2501_v43  ;;  %v2445_v34 = vpop.xlane.xlu1 %2444 }
 0x3b3   :  { %v3771_v36 = vpop.eup %3770  ;;  %3776 = vlog2.f32 %v2445_v34 }
 0x3b4   :  { %2595 = vst [vmem:[#allocation8 + $0x8] sm:$0xff] %v2563_v44  ;;  %v2499_v18 = vmul.f32 0.6931472, %v3771_v36  ;;  %v2443_v49 = vpop.xlane.xlu0 %2442 }
 0x3b5   :  { %3778 = vlog2.f32 %v2443_v49 }
 0x3b6   :  { %v2562_v16 = vsub.f32 %v4253_v2, %v2499_v18 }
 0x3b7   :  { %v3773_v62 = vpop.eup %3772 }
 0x3b8   :  { %2594 = vst [vmem:[#allocation8] sm:$0xff] %v2562_v16  ;;  %v2505_v7 = vmul.f32 0.6931472, %v3773_v62 }
 0x3ba   :  { %v2565_v11 = vsub.f32 %v4257_v6, %v2505_v7  ;;  %v2449_v51 = vpop.xlane.xlu1 %2448 }
 0x3bb   :  { %v3775_v10 = vpop.eup %3774  ;;  %3780 = vlog2.f32 %v2449_v51 }
 0x3bc   :  { %2597 = vst [vmem:[#allocation8 + $0x18] sm:$0xff] %v2565_v11  ;;  %v2503_v40 = vmul.f32 0.6931472, %v3775_v10  ;;  %v2447_v33 = vpop.xlane.xlu0 %2446 }
 0x3bd   :  { %3782 = vlog2.f32 %v2447_v33 }
 0x3be   :  { %v2564_v20 = vsub.f32 %v4261_v12, %v2503_v40 }
 0x3c0   :  { %v3777_v15 = vpop.eup %3776  ;;  %2596 = vst [vmem:[#allocation8 + $0x10] sm:$0xff] %v2564_v20 }
 0x3c1   :  { %v2509_v4 = vmul.f32 0.6931472, %v3777_v15  ;;  %v2453_v24 = vpop.xlane.xlu1 %2452 }
 0x3c2   :  { %v3779_v35 = vpop.eup %3778  ;;  %3784 = vlog2.f32 %v2453_v24 }
 0x3c3   :  { %v2567_v2 = vsub.f32 %v4265_v58, %v2509_v4  ;;  %v2507_v52 = vmul.f32 0.6931472, %v3779_v35  ;;  %v2451_v26 = vpop.xlane.xlu0 %2450 }
 0x3c4   :  { %3786 = vlog2.f32 %v2451_v26 }
 0x3c5   :  { %2599 = vst [vmem:[#allocation8 + $0x28] sm:$0xff] %v2567_v2  ;;  %v2566_v6 = vsub.f32 %v4269_v59, %v2507_v52 }
 0x3c7   :  { %2598 = vst [vmem:[#allocation8 + $0x20] sm:$0xff] %v2566_v6 }
 0x3c8   :  { %v3781_v17 = vpop.eup %3780 }
 0x3c9   :  { %v2513_v13 = vmul.f32 0.6931472, %v3781_v17  ;;  %v2457_v60 = vpop.xlane.xlu1 %2456 }
 0x3ca   :  { %v3783_v38 = vpop.eup %3782  ;;  %3788 = vlog2.f32 %v2457_v60 }
 0x3cb   :  { %v2569_v12 = vsub.f32 %v4273_v5, %v2513_v13  ;;  %v2511_v32 = vmul.f32 0.6931472, %v3783_v38  ;;  %v2455_v54 = vpop.xlane.xlu0 %2454 }
 0x3cc   :  { %3790 = vlog2.f32 %v2455_v54 }
 0x3cd   :  { %2601 = vst [vmem:[#allocation8 + $0x38] sm:$0xff] %v2569_v12  ;;  %v2568_v58 = vsub.f32 %v4277_v42, %v2511_v32 }
 0x3cf   :  { %v3785_v31 = vpop.eup %3784  ;;  %2600 = vst [vmem:[#allocation8 + $0x30] sm:$0xff] %v2568_v58 }
 0x3d0   :  { %v2517_v41 = vmul.f32 0.6931472, %v3785_v31 }
 0x3d1   :  { %v3787_v56 = vpop.eup %3786 }
 0x3d2   :  { %v2571_v59 = vsub.f32 %v4281_v47, %v2517_v41  ;;  %v2515_v8 = vmul.f32 0.6931472, %v3787_v56  ;;  %v2461_v21 = vpop.xlane.xlu1 %2460 }
 0x3d3   :  { %3792 = vlog2.f32 %v2461_v21 }
 0x3d4   :  { %2603 = vst [vmem:[#allocation8 + $0x48] sm:$0xff] %v2571_v59  ;;  %v2570_v55 = vsub.f32 %v4285_v61, %v2515_v8  ;;  %v2459_v43 = vpop.xlane.xlu0 %2458 }
 0x3d5   :  { %3794 = vlog2.f32 %v2459_v43 }
 0x3d6   :  { %2602 = vst [vmem:[#allocation8 + $0x40] sm:$0xff] %v2570_v55 }
 0x3d7   :  { %v3789_v5 = vpop.eup %3788 }
 0x3d8   :  { %v2521_v44 = vmul.f32 0.6931472, %v3789_v5 }
 0x3d9   :  { %v3791_v34 = vpop.eup %3790 }
 0x3da   :  { %v2573_v42 = vsub.f32 %v4289_v53, %v2521_v44  ;;  %v2519_v36 = vmul.f32 0.6931472, %v3791_v34  ;;  %v2465_v18 = vpop.xlane.xlu1 %2464 }
 0x3db   :  { %3796 = vlog2.f32 %v2465_v18 }
 0x3dc   :  { %2605 = vst [vmem:[#allocation8 + $0x58] sm:$0xff] %v2573_v42  ;;  %v2572_v47 = vsub.f32 %v4293_v14, %v2519_v36  ;;  %v2463_v49 = vpop.xlane.xlu0 %2462 }
 0x3dd   :  { %3798 = vlog2.f32 %v2463_v49 }
 0x3de   :  { %2604 = vst [vmem:[#allocation8 + $0x50] sm:$0xff] %v2572_v47 }
 0x3e0   :  { %v3793_v16 = vpop.eup %3792 }
 0x3e1   :  { %v2525_v62 = vmul.f32 0.6931472, %v3793_v16  ;;  %v2469_v61 = vpop.xlane.xlu1 %2468 }
 0x3e2   :  { %v3795_v7 = vpop.eup %3794  ;;  %3800 = vlog2.f32 %v2469_v61 }
 0x3e3   :  { %v2575_v11 = vsub.f32 %v4297_v45, %v2525_v62  ;;  %v2523_v51 = vmul.f32 0.6931472, %v3795_v7  ;;  %v2467_v10 = vpop.xlane.xlu0 %2466 }
 0x3e4   :  { %3802 = vlog2.f32 %v2467_v10 }
 0x3e5   :  { %2607 = vst [vmem:[#allocation8 + $0x68] sm:$0xff] %v2575_v11  ;;  %v2574_v53 = vsub.f32 %v4301_v57, %v2523_v51 }
 0x3e7   :  { %2606 = vst [vmem:[#allocation8 + $0x60] sm:$0xff] %v2574_v53 }
 0x3e8   :  { %v3797_v40 = vpop.eup %3796 }
 0x3e9   :  { %v2529_v33 = vmul.f32 0.6931472, %v3797_v40  ;;  %v2473_v14 = vpop.xlane.xlu1 %2472 }
 0x3ea   :  { %v3799_v20 = vpop.eup %3798  ;;  %3804 = vlog2.f32 %v2473_v14 }
 0x3eb   :  { %v2577_v15 = vsub.f32 %v4305_v29, %v2529_v33  ;;  %v2527_v4 = vmul.f32 0.6931472, %v3799_v20  ;;  %v2471_v24 = vpop.xlane.xlu0 %2470 }
 0x3ec   :  { %3806 = vlog2.f32 %v2471_v24 }
 0x3ed   :  { %2609 = vst [vmem:[#allocation8 + $0x78] sm:$0xff] %v2577_v15  ;;  %v2576_v45 = vsub.f32 %v4309_v28, %v2527_v4 }
 0x3ef   :  { %v3801_v35 = vpop.eup %3800  ;;  %2608 = vst [vmem:[#allocation8 + $0x70] sm:$0xff] %v2576_v45 }
 0x3f0   :  { %v2533_v2 = vmul.f32 0.6931472, %v3801_v35 }
 0x3f1   :  { %v3803_v52 = vpop.eup %3802 }
 0x3f2   :  { %v2579_v57 = vsub.f32 %v4313_v1, %v2533_v2  ;;  %v2531_v26 = vmul.f32 0.6931472, %v3803_v52  ;;  %v2477_v6 = vpop.xlane.xlu1 %2476 }
 0x3f3   :  { %3808 = vlog2.f32 %v2477_v6 }
 0x3f4   :  { %2611 = vst [vmem:[#allocation8 + $0x88] sm:$0xff] %v2579_v57  ;;  %v2578_v17 = vsub.f32 %v4317_v39, %v2531_v26  ;;  %v2475_v13 = vpop.xlane.xlu0 %2474 }
 0x3f5   :  { %3810 = vlog2.f32 %v2475_v13 }
 0x3f6   :  { %2610 = vst [vmem:[#allocation8 + $0x80] sm:$0xff] %v2578_v17 }
 0x3f7   :  { %v3805_v29 = vpop.eup %3804 }
 0x3f8   :  { %v2537_v60 = vmul.f32 0.6931472, %v3805_v29 }
 0x3f9   :  { %v3807_v38 = vpop.eup %3806 }
 0x3fa   :  { %v2581_v28 = vsub.f32 %v4321_v19, %v2537_v60  ;;  %v2535_v12 = vmul.f32 0.6931472, %v3807_v38  ;;  %v2481_v32 = vpop.xlane.xlu1 %2480 }
 0x3fb   :  { %3812 = vlog2.f32 %v2481_v32 }
 0x3fc   :  { %2613 = vst [vmem:[#allocation8 + $0x98] sm:$0xff] %v2581_v28  ;;  %v2580_v1 = vsub.f32 %v4325_v50, %v2535_v12  ;;  %v2479_v54 = vpop.xlane.xlu0 %2478 }
 0x3fd   :  { %3814 = vlog2.f32 %v2479_v54 }
 0x3fe   :  { %2612 = vst [vmem:[#allocation8 + $0x90] sm:$0xff] %v2580_v1 }
 0x400   :  { %v3809_v58 = vpop.eup %3808 }
 0x401   :  { %v2541_v31 = vmul.f32 0.6931472, %v3809_v58  ;;  %v2485_v39 = vpop.xlane.xlu1 %2484 }
 0x402   :  { %v3811_v41 = vpop.eup %3810  ;;  %3816 = vlog2.f32 %v2485_v39 }
 0x403   :  { %v2583_v56 = vsub.f32 %v4329_v9, %v2541_v31  ;;  %v2539_v59 = vmul.f32 0.6931472, %v3811_v41  ;;  %v2483_v8 = vpop.xlane.xlu0 %2482 }
 0x404   :  { %3818 = vlog2.f32 %v2483_v8 }
 0x405   :  { %2615 = vst [vmem:[#allocation8 + $0xa8] sm:$0xff] %v2583_v56  ;;  %v2582_v19 = vsub.f32 %v4333_v48, %v2539_v59 }
 0x407   :  { %2614 = vst [vmem:[#allocation8 + $0xa0] sm:$0xff] %v2582_v19 }
 0x408   :  { %v3813_v21 = vpop.eup %3812 }
 0x409   :  { %v2545_v55 = vmul.f32 0.6931472, %v3813_v21  ;;  %v2489_v50 = vpop.xlane.xlu1 %2488 }
 0x40a   :  { %v3815_v43 = vpop.eup %3814  ;;  %3820 = vlog2.f32 %v2489_v50 }
 0x40b   :  { %v2585_v5 = vsub.f32 %v4337_v46, %v2545_v55  ;;  %v2543_v44 = vmul.f32 0.6931472, %v3815_v43  ;;  %v2487_v34 = vpop.xlane.xlu0 %2486 }
 0x40c   :  { %3822 = vlog2.f32 %v2487_v34 }
 0x40d   :  { %2617 = vst [vmem:[#allocation8 + $0xb8] sm:$0xff] %v2585_v5  ;;  %v2584_v9 = vsub.f32 %v4341_v37, %v2543_v44 }
 0x40f   :  { %v3817_v42 = vpop.eup %3816  ;;  %2616 = vst [vmem:[#allocation8 + $0xb0] sm:$0xff] %v2584_v9 }
 0x410   :  { %v2549_v36 = vmul.f32 0.6931472, %v3817_v42 }
 0x411   :  { %v3819_v18 = vpop.eup %3818 }
 0x412   :  { %v2587_v48 = vsub.f32 %v4345_v27, %v2549_v36  ;;  %v2547_v47 = vmul.f32 0.6931472, %v3819_v18  ;;  %v2493_v49 = vpop.xlane.xlu1 %2492 }
 0x413   :  { %3824 = vlog2.f32 %v2493_v49 }
 0x414   :  { %2619 = vst [vmem:[#allocation8 + $0xc8] sm:$0xff] %v2587_v48  ;;  %v2586_v16 = vsub.f32 %v4349_v63, %v2547_v47  ;;  %v2491_v62 = vpop.xlane.xlu0 %2490 }
 0x415   :  { %3826 = vlog2.f32 %v2491_v62 }
 0x416   :  { %2618 = vst [vmem:[#allocation8 + $0xc0] sm:$0xff] %v2586_v16 }
 0x417   :  { %v3821_v46 = vpop.eup %3820 }
 0x418   :  { %v2553_v61 = vmul.f32 0.6931472, %v3821_v46 }
 0x419   :  { %v3823_v7 = vpop.eup %3822 }
 0x41a   :  { %v2589_v37 = vsub.f32 %v4353_v22, %v2553_v61  ;;  %v2551_v11 = vmul.f32 0.6931472, %v3823_v7  ;;  %v2497_v51 = vpop.xlane.xlu1 %2496 }
 0x41b   :  { %3828 = vlog2.f32 %v2497_v51 }
 0x41c   :  { %2621 = vst [vmem:[#allocation8 + $0xd8] sm:$0xff] %v2589_v37  ;;  %v2588_v27 = vsub.f32 %v4357_v3, %v2551_v11  ;;  %v2495_v10 = vpop.xlane.xlu0 %2494 }
 0x41d   :  { %3830 = vlog2.f32 %v2495_v10 }
 0x41e   :  { %2620 = vst [vmem:[#allocation8 + $0xd0] sm:$0xff] %v2588_v27 }
 0x420   :  { %v3825_v53 = vpop.eup %3824 }
 0x421   :  { %v2557_v40 = vmul.f32 0.6931472, %v3825_v53 }
 0x422   :  { %v3827_v63 = vpop.eup %3826 }
 0x423   :  { %v2591_v33 = vsub.f32 %v4361_v23, %v2557_v40  ;;  %v2555_v14 = vmul.f32 0.6931472, %v3827_v63 }
 0x425   :  { %2623 = vst [vmem:[#allocation8 + $0xe8] sm:$0xff] %v2591_v33  ;;  %v2590_v20 = vsub.f32 %v4365_v0, %v2555_v14 }
 0x427   :  { %2622 = vst [vmem:[#allocation8 + $0xe0] sm:$0xff] %v2590_v20 }
 0x428   :  { %v3829_v22 = vpop.eup %3828 }
 0x429   :  { %v2561_v15 = vmul.f32 0.6931472, %v3829_v22 }
 0x42a   :  { %v3831_v4 = vpop.eup %3830 }
 0x42b   :  { %v2593_v3 = vsub.f32 %v4369_v25, %v2561_v15  ;;  %v2559_v24 = vmul.f32 0.6931472, %v3831_v4 }
 0x42d   :  { %2625 = vst [vmem:[#allocation8 + $0xf8] sm:$0xff] %v2593_v3  ;;  %v2592_v45 = vsub.f32 %v4373_v30, %v2559_v24 }
 0x42f   :  { %2624 = vst [vmem:[#allocation8 + $0xf0] sm:$0xff] %v2592_v45 }
 0x430   :  { %3903 = shalt.err (!%p3900_p5)
}
 0x431   :  { %2637 = dma.vmem_to_hbm [thread:$0]  %s2632_s14, 4096, %s4419_s5, [#allocation4], %s3925_s9, %s3925_s9, %s3926_s10  }
 0x432   :  { %3916 = dma.done.wait [#allocation4], 4096  }
 0x433   :  { %3917 = vsyncadd [#allocation4], 4294963200 }
 0x434   :  { %2641 = vsyncpa [#allocation3], 1 }
 0x435   :  { %2642 = vsyncpa [#allocation6], 1 }
 0x436   :  { %2643 = vsyncpa [#allocation4], 1 }

</bundles_post_ra>
